<compile_context>
chip_gen: v7x
topology: tpu7x:2x2x1
jax: 0.10.0
libtpu: 0.0.40
codegen_flags: <defaults>
</compile_context>

<pallas_src>
import jax
import jax.numpy as jnp
from jax.experimental import pallas as pl
from jax.experimental.pallas import tpu as pltpu

# ---------------- small ViT config (ViT-B/32 structure, scaled down) --------
PATCH = 8
WIDTH = 32               # transformer width
HEADS = 4
HEAD_DIM = WIDTH // HEADS
LAYERS = 2
EMBED_DIM = 16           # CLIP image-feature dim (512 in real ViT-B/32)
MLP_DIM = 4 * WIDTH
IMG_SIZE = 16
GRID_TOKENS = (IMG_SIZE // PATCH) ** 2       # 4 patches
S_REAL = GRID_TOKENS + 1                     # 5 tokens (class + patches)
S_PAD = 8                                    # padded to a sublane multiple
CPP = 3 * PATCH * PATCH                      # 192 (flattened patch)


# ----------------------------- fused kernel --------------------------------

def _clip_fused_kernel(
    patches_ref, conv_w_ref, add_emb_ref, ln_pre_g_ref, ln_pre_b_ref,
    ln1_g_ref, ln1_b_ref, w_qkv_ref, b_qkv_ref, wo_ref, bo_ref,
    ln2_g_ref, ln2_b_ref, w_fc_ref, b_fc_ref, w_pr_ref, b_pr_ref,
    ln_post_g_ref, ln_post_b_ref, proj_ref, txt_ref,
    out_ref,
):
    f32 = jnp.float32
    bf16 = jnp.bfloat16

    def ln(z, g, b):                                    # row-wise LayerNorm (f32)
        mu = jnp.mean(z, axis=-1, keepdims=True)
        zc = z - mu
        var = jnp.mean(zc * zc, axis=-1, keepdims=True)
        return zc * jax.lax.rsqrt(var + 1e-5) * g + b

    # --- patch embedding (conv == matmul, bf16 MXU / f32 acc) + class/pos ---
    x = jnp.dot(patches_ref[0], conv_w_ref[...], preferred_element_type=f32)
    x = x + add_emb_ref[...]                            # (S_PAD, WIDTH) f32
    x = ln(x, ln_pre_g_ref[...], ln_pre_b_ref[...])

    # additive key-padding mask: padded key positions (>= S_REAL) -> -inf
    kidx = jax.lax.broadcasted_iota(jnp.int32, (S_PAD, S_PAD), 1)
    key_bias = jnp.where(kidx < S_REAL, 0.0, -1e30).astype(f32)
    scale = 1.0 / (HEAD_DIM ** 0.5)

    for l in range(LAYERS):
        # ---- attention sub-block (pre-LN, fused QKV, heads in-kernel) ----
        h = ln(x, ln1_g_ref[l], ln1_b_ref[l])
        qkv = jnp.dot(h.astype(bf16), w_qkv_ref[l],
                      preferred_element_type=f32) + b_qkv_ref[l]   # (S_PAD, 3W)
        wo_l = wo_ref[l]                                           # (W, W) bf16
        o = jnp.zeros((S_PAD, WIDTH), f32)
        for hh in range(HEADS):
            lo = hh * HEAD_DIM
            qh = qkv[:, lo:lo + HEAD_DIM].astype(bf16)
            kh = qkv[:, WIDTH + lo:WIDTH + lo + HEAD_DIM].astype(bf16)
            vh = qkv[:, 2 * WIDTH + lo:2 * WIDTH + lo + HEAD_DIM].astype(bf16)
            s = jnp.einsum("qd,kd->qk", qh, kh,
                           preferred_element_type=f32) * scale + key_bias
            m = jnp.max(s, axis=-1, keepdims=True)
            p = jnp.exp(s - m)
            p = p * pl.reciprocal(jnp.sum(p, axis=-1, keepdims=True), approx=True)
            oh = jnp.dot(p.astype(bf16), vh, preferred_element_type=f32)
            # head-merge folded into the output projection: oh @ wo[lo:lo+Dh, :]
            o = o + jnp.dot(oh.astype(bf16), wo_l[lo:lo + HEAD_DIM, :],
                            preferred_element_type=f32)
        x = x + o + bo_ref[l]

        # ---- MLP sub-block (pre-LN, QuickGELU in f32) ----
        h = ln(x, ln2_g_ref[l], ln2_b_ref[l])
        h = jnp.dot(h.astype(bf16), w_fc_ref[l],
                    preferred_element_type=f32) + b_fc_ref[l]
        h = h * jax.nn.sigmoid(1.702 * h)               # QuickGELU
        h = jnp.dot(h.astype(bf16), w_pr_ref[l],
                    preferred_element_type=f32) + b_pr_ref[l]
        x = x + h

    # ---- post-LN on class token + projection to EMBED_DIM ----
    cls = ln(x[0:1, :], ln_post_g_ref[...], ln_post_b_ref[...])     # (1, W)
    feat = jnp.dot(cls.astype(bf16), proj_ref[...],
                   preferred_element_type=f32)                      # (1, E)

    # ---- normalize + bmm with text features + softmax(dim=-1) ----
    inv_norm = jax.lax.rsqrt(jnp.sum(feat * feat, axis=-1, keepdims=True))
    f2 = feat * inv_norm                                            # (1, E)
    t = txt_ref[0]                                                  # (T, E)
    sim = jnp.einsum("qe,te->qt", f2, t, preferred_element_type=f32)  # (1, T)
    m = jnp.max(sim, axis=-1, keepdims=True)
    p = jnp.exp(sim - m)
    p = p * pl.reciprocal(jnp.sum(p, axis=-1, keepdims=True), approx=True)
    out_ref[...] = p.reshape(1, 1, p.shape[-1])


# ------------------------ parameters (synthetic) ----------------------------

def init_params(key):
    def nrm(k, shape, scale=0.02):
        return scale * jax.random.normal(k, shape, jnp.float32)

    keys = iter(jax.random.split(key, 8))
    return {
        "conv_w": nrm(next(keys), (CPP, WIDTH)),            # patch-embed (no bias)
        "class_emb": nrm(next(keys), (WIDTH,)),
        "pos_emb": nrm(next(keys), (S_REAL, WIDTH)),
        "ln_pre_g": jnp.ones((1, WIDTH), jnp.float32),
        "ln_pre_b": jnp.zeros((1, WIDTH), jnp.float32),
        "ln_post_g": jnp.ones((1, WIDTH), jnp.float32),
        "ln_post_b": jnp.zeros((1, WIDTH), jnp.float32),
        "proj": nrm(next(keys), (WIDTH, EMBED_DIM)),
        # per-layer parameters, stacked along a leading LAYERS axis
        "ln1_g": jnp.ones((LAYERS, 1, WIDTH), jnp.float32),
        "ln1_b": jnp.zeros((LAYERS, 1, WIDTH), jnp.float32),
        "w_qkv": nrm(next(keys), (LAYERS, WIDTH, 3 * WIDTH)),
        "b_qkv": jnp.zeros((LAYERS, 1, 3 * WIDTH), jnp.float32),
        "wo": nrm(next(keys), (LAYERS, WIDTH, WIDTH)),
        "bo": jnp.zeros((LAYERS, 1, WIDTH), jnp.float32),
        "ln2_g": jnp.ones((LAYERS, 1, WIDTH), jnp.float32),
        "ln2_b": jnp.zeros((LAYERS, 1, WIDTH), jnp.float32),
        "w_fc": nrm(next(keys), (LAYERS, WIDTH, MLP_DIM)),
        "b_fc": jnp.zeros((LAYERS, 1, MLP_DIM), jnp.float32),
        "w_pr": nrm(next(keys), (LAYERS, MLP_DIM, WIDTH)),
        "b_pr": jnp.zeros((LAYERS, 1, WIDTH), jnp.float32),
    }


# ------------------------------ forward wrapper ------------------------------

def clip_model_forward(img, txt, params):
    """ClipModel.forward: softmaxed bmm similarity, shape (B, 1, T)
    (torch's .squeeze(0) is a no-op for batch > 1)."""
    B, C, H, W_img = img.shape
    gh, gw = H // PATCH, W_img // PATCH
    G = gh * gw
    T = txt.shape[1]
    bf16 = jnp.bfloat16

    # ---- plain-JAX glue: patchify + pad token axis 5 -> S_PAD (zeros) ----
    patches = (img.reshape(B, C, gh, PATCH, gw, PATCH)
                  .transpose(0, 2, 4, 1, 3, 5)
                  .reshape(B, G, CPP))
    patches_pad = jnp.zeros((B, S_PAD, CPP), jnp.float32)
    patches_pad = patches_pad.at[:, 1:1 + G, :].set(patches)   # row 0 = class slot
    patches_pad = patches_pad.astype(bf16)

    # class token + positional embedding folded into one additive slab
    add_emb = jnp.zeros((S_PAD, WIDTH), jnp.float32)
    add_emb = add_emb.at[:S_REAL, :].set(params["pos_emb"])
    add_emb = add_emb.at[0, :].add(params["class_emb"])

    to_bf16 = lambda a: a.astype(bf16)     # MXU operands in bf16, f32 accumulate
    l3 = lambda b: (0, 0, 0)
    l2 = lambda b: (0, 0)

    return pl.pallas_call(
        _clip_fused_kernel,
        out_shape=jax.ShapeDtypeStruct((B, 1, T), jnp.float32),
        grid=(B,),
        in_specs=[
            pl.BlockSpec((1, S_PAD, CPP), lambda b: (b, 0, 0)),      # patches
            pl.BlockSpec((CPP, WIDTH), l2),                          # conv_w
            pl.BlockSpec((S_PAD, WIDTH), l2),                        # add_emb
            pl.BlockSpec((1, WIDTH), l2),                            # ln_pre_g
            pl.BlockSpec((1, WIDTH), l2),                            # ln_pre_b
            pl.BlockSpec((LAYERS, 1, WIDTH), l3),                    # ln1_g
            pl.BlockSpec((LAYERS, 1, WIDTH), l3),                    # ln1_b
            pl.BlockSpec((LAYERS, WIDTH, 3 * WIDTH), l3),            # w_qkv
            pl.BlockSpec((LAYERS, 1, 3 * WIDTH), l3),                # b_qkv
            pl.BlockSpec((LAYERS, WIDTH, WIDTH), l3),                # wo
            pl.BlockSpec((LAYERS, 1, WIDTH), l3),                    # bo
            pl.BlockSpec((LAYERS, 1, WIDTH), l3),                    # ln2_g
            pl.BlockSpec((LAYERS, 1, WIDTH), l3),                    # ln2_b
            pl.BlockSpec((LAYERS, WIDTH, MLP_DIM), l3),              # w_fc
            pl.BlockSpec((LAYERS, 1, MLP_DIM), l3),                  # b_fc
            pl.BlockSpec((LAYERS, MLP_DIM, WIDTH), l3),              # w_pr
            pl.BlockSpec((LAYERS, 1, WIDTH), l3),                    # b_pr
            pl.BlockSpec((1, WIDTH), l2),                            # ln_post_g
            pl.BlockSpec((1, WIDTH), l2),                            # ln_post_b
            pl.BlockSpec((WIDTH, EMBED_DIM), l2),                    # proj
            pl.BlockSpec((1, T, EMBED_DIM), lambda b: (b, 0, 0)),    # txt
        ],
        out_specs=pl.BlockSpec((1, 1, T), lambda b: (b, 0, 0)),
        compiler_params=pltpu.CompilerParams(
            dimension_semantics=("parallel",),    # batch axis -> both TCs on v7x
        ),
    )(
        patches_pad, to_bf16(params["conv_w"]), add_emb,
        params["ln_pre_g"], params["ln_pre_b"],
        params["ln1_g"], params["ln1_b"],
        to_bf16(params["w_qkv"]), params["b_qkv"],
        to_bf16(params["wo"]), params["bo"],
        params["ln2_g"], params["ln2_b"],
        to_bf16(params["w_fc"]), params["b_fc"],
        to_bf16(params["w_pr"]), params["b_pr"],
        params["ln_post_g"], params["ln_post_b"],
        to_bf16(params["proj"]), txt,
    )


# ---------------------------------- main ------------------------------------

if __name__ == "__main__":
    key = jax.random.PRNGKey(0)
    k_img, k_txt, k_par = jax.random.split(key, 3)

    B, T = 2, 8
    img = jax.random.normal(k_img, (B, 3, IMG_SIZE, IMG_SIZE), jnp.float32)  # NCHW
    txt = jax.random.normal(k_txt, (B, T, EMBED_DIM), jnp.float32)
    params = init_params(k_par)

    # TODO(synk): pretrained CLIP ViT-B/32 checkpoint weights (clip.load) cannot
    # be loaded here; parameters are synthetic (deterministic PRNG) with
    # identical structure.
    out = jax.jit(clip_model_forward)(img, txt, params)
    out = jax.block_until_ready(out)

    assert out.shape == (B, 1, T), out.shape
    row_sums = jnp.sum(out, axis=-1)
    assert bool(jnp.all(jnp.abs(row_sums - 1.0) < 1e-2)), row_sums
    print("KERNEL_OK")
</pallas_src>

<mosaic_0001>
module attributes {stable_mosaic.version = 11 : i64} {
  func.func @_clip_fused_kernel(%arg0: i32, %arg1: memref<1x8x192xbf16, #tpu.memory_space<vmem>>, %arg2: memref<192x32xbf16, #tpu.memory_space<vmem>>, %arg3: memref<8x32xf32, #tpu.memory_space<vmem>>, %arg4: memref<1x32xf32, #tpu.memory_space<vmem>>, %arg5: memref<1x32xf32, #tpu.memory_space<vmem>>, %arg6: memref<2x1x32xf32, #tpu.memory_space<vmem>>, %arg7: memref<2x1x32xf32, #tpu.memory_space<vmem>>, %arg8: memref<2x32x96xbf16, #tpu.memory_space<vmem>>, %arg9: memref<2x1x96xf32, #tpu.memory_space<vmem>>, %arg10: memref<2x32x32xbf16, #tpu.memory_space<vmem>>, %arg11: memref<2x1x32xf32, #tpu.memory_space<vmem>>, %arg12: memref<2x1x32xf32, #tpu.memory_space<vmem>>, %arg13: memref<2x1x32xf32, #tpu.memory_space<vmem>>, %arg14: memref<2x32x128xbf16, #tpu.memory_space<vmem>>, %arg15: memref<2x1x128xf32, #tpu.memory_space<vmem>>, %arg16: memref<2x128x32xbf16, #tpu.memory_space<vmem>>, %arg17: memref<2x1x32xf32, #tpu.memory_space<vmem>>, %arg18: memref<1x32xf32, #tpu.memory_space<vmem>>, %arg19: memref<1x32xf32, #tpu.memory_space<vmem>>, %arg20: memref<32x16xbf16, #tpu.memory_space<vmem>>, %arg21: memref<1x8x16xf32, #tpu.memory_space<vmem>>, %arg22: memref<1x1x8xf32, #tpu.memory_space<vmem>>) attributes {dimension_semantics = [#tpu.dimension_semantics<parallel>], iteration_bounds = array<i64: 2>, scalar_prefetch = 0 : i64, scratch_operands = 0 : i64, tpu.core_type = #tpu.core_type<tc>, window_params = [{transform_indices = @transform_0, window_bounds = array<i64: 1, 8, 192>}, {pipeline_mode = #tpu.pipeline_mode<synchronous>, transform_indices = @transform_1, window_bounds = array<i64: 192, 32>}, {pipeline_mode = #tpu.pipeline_mode<synchronous>, transform_indices = @transform_2, window_bounds = array<i64: 8, 32>}, {pipeline_mode = #tpu.pipeline_mode<synchronous>, transform_indices = @transform_3, window_bounds = array<i64: 1, 32>}, {pipeline_mode = #tpu.pipeline_mode<synchronous>, transform_indices = @transform_4, window_bounds = array<i64: 1, 32>}, {pipeline_mode = #tpu.pipeline_mode<synchronous>, transform_indices = @transform_5, window_bounds = array<i64: 2, 1, 32>}, {pipeline_mode = #tpu.pipeline_mode<synchronous>, transform_indices = @transform_6, window_bounds = array<i64: 2, 1, 32>}, {pipeline_mode = #tpu.pipeline_mode<synchronous>, transform_indices = @transform_7, window_bounds = array<i64: 2, 32, 96>}, {pipeline_mode = #tpu.pipeline_mode<synchronous>, transform_indices = @transform_8, window_bounds = array<i64: 2, 1, 96>}, {pipeline_mode = #tpu.pipeline_mode<synchronous>, transform_indices = @transform_9, window_bounds = array<i64: 2, 32, 32>}, {pipeline_mode = #tpu.pipeline_mode<synchronous>, transform_indices = @transform_10, window_bounds = array<i64: 2, 1, 32>}, {pipeline_mode = #tpu.pipeline_mode<synchronous>, transform_indices = @transform_11, window_bounds = array<i64: 2, 1, 32>}, {pipeline_mode = #tpu.pipeline_mode<synchronous>, transform_indices = @transform_12, window_bounds = array<i64: 2, 1, 32>}, {pipeline_mode = #tpu.pipeline_mode<synchronous>, transform_indices = @transform_13, window_bounds = array<i64: 2, 32, 128>}, {pipeline_mode = #tpu.pipeline_mode<synchronous>, transform_indices = @transform_14, window_bounds = array<i64: 2, 1, 128>}, {pipeline_mode = #tpu.pipeline_mode<synchronous>, transform_indices = @transform_15, window_bounds = array<i64: 2, 128, 32>}, {pipeline_mode = #tpu.pipeline_mode<synchronous>, transform_indices = @transform_16, window_bounds = array<i64: 2, 1, 32>}, {pipeline_mode = #tpu.pipeline_mode<synchronous>, transform_indices = @transform_17, window_bounds = array<i64: 1, 32>}, {pipeline_mode = #tpu.pipeline_mode<synchronous>, transform_indices = @transform_18, window_bounds = array<i64: 1, 32>}, {pipeline_mode = #tpu.pipeline_mode<synchronous>, transform_indices = @transform_19, window_bounds = array<i64: 32, 16>}, {transform_indices = @transform_20, window_bounds = array<i64: 1, 8, 16>}, {transform_indices = @transform_21, window_bounds = array<i64: 1, 1, 8>}]} {
    %c0 = arith.constant 0 : index
    %c0_0 = arith.constant 0 : index
    %c0_1 = arith.constant 0 : index
    %0 = vector.load %arg1[%c0, %c0_0, %c0_1] : memref<1x8x192xbf16, #tpu.memory_space<vmem>>, vector<1x8x192xbf16>
    %1 = vector.shape_cast %0 : vector<1x8x192xbf16> to vector<8x192xbf16>
    %c0_2 = arith.constant 0 : index
    %c0_3 = arith.constant 0 : index
    %2 = vector.load %arg2[%c0_2, %c0_3] : memref<192x32xbf16, #tpu.memory_space<vmem>>, vector<192x32xbf16>
    %cst = arith.constant dense<0.000000e+00> : vector<8x32xf32>
    %3 = tpu.matmul %1, %2, %cst {dimension_numbers = #tpu.dot_dimension_numbers<[1], [0], [0], [1], [0, 0, 1, 1], [], []>} : vector<8x192xbf16>, vector<192x32xbf16>, vector<8x32xf32> -> vector<8x32xf32>
    %c0_4 = arith.constant 0 : index
    %c0_5 = arith.constant 0 : index
    %4 = vector.load %arg3[%c0_4, %c0_5] : memref<8x32xf32, #tpu.memory_space<vmem>>, vector<8x32xf32>
    %5 = arith.addf %3, %4 : vector<8x32xf32>
    %c0_6 = arith.constant 0 : index
    %c0_7 = arith.constant 0 : index
    %6 = vector.load %arg4[%c0_6, %c0_7] : memref<1x32xf32, #tpu.memory_space<vmem>>, vector<1x32xf32>
    %c0_8 = arith.constant 0 : index
    %c0_9 = arith.constant 0 : index
    %7 = vector.load %arg5[%c0_8, %c0_9] : memref<1x32xf32, #tpu.memory_space<vmem>>, vector<1x32xf32>
    %cst_10 = arith.constant dense<0.000000e+00> : vector<8xf32>
    %8 = vector.multi_reduction <add>, %5, %cst_10 [1] : vector<8x32xf32> to vector<8xf32>
    %9 = vector.shape_cast %8 : vector<8xf32> to vector<8x1xf32>
    %cst_11 = arith.constant 3.200000e+01 : f32
    %10 = vector.broadcast %cst_11 : f32 to vector<8x1xf32>
    %11 = arith.divf %9, %10 : vector<8x1xf32>
    %12 = vector.broadcast %11 : vector<8x1xf32> to vector<8x32xf32>
    %13 = arith.subf %5, %12 : vector<8x32xf32>
    %14 = arith.mulf %13, %13 : vector<8x32xf32>
    %cst_12 = arith.constant dense<0.000000e+00> : vector<8xf32>
    %15 = vector.multi_reduction <add>, %14, %cst_12 [1] : vector<8x32xf32> to vector<8xf32>
    %16 = vector.shape_cast %15 : vector<8xf32> to vector<8x1xf32>
    %cst_13 = arith.constant 3.200000e+01 : f32
    %17 = vector.broadcast %cst_13 : f32 to vector<8x1xf32>
    %18 = arith.divf %16, %17 : vector<8x1xf32>
    %cst_14 = arith.constant 9.99999974E-6 : f32
    %19 = vector.broadcast %cst_14 : f32 to vector<8x1xf32>
    %20 = arith.addf %18, %19 : vector<8x1xf32>
    %21 = math.rsqrt %20 : vector<8x1xf32>
    %22 = vector.broadcast %21 : vector<8x1xf32> to vector<8x32xf32>
    %23 = arith.mulf %13, %22 : vector<8x32xf32>
    %24 = vector.broadcast %6 : vector<1x32xf32> to vector<8x32xf32>
    %25 = arith.mulf %23, %24 : vector<8x32xf32>
    %26 = vector.broadcast %7 : vector<1x32xf32> to vector<8x32xf32>
    %27 = arith.addf %25, %26 : vector<8x32xf32>
    %28 = tpu.iota {dimensions = array<i32: 1>} : vector<8x8xi32>
    %c5_i32 = arith.constant 5 : i32
    %29 = vector.broadcast %c5_i32 : i32 to vector<8x8xi32>
    %30 = arith.cmpi slt, %28, %29 : vector<8x8xi32>
    %cst_15 = arith.constant 0.000000e+00 : f32
    %cst_16 = arith.constant -1.000000e+30 : f32
    %31 = vector.broadcast %cst_15 : f32 to vector<8x8xf32>
    %32 = vector.broadcast %cst_16 : f32 to vector<8x8xf32>
    %33 = arith.select %30, %31, %32 : vector<8x8xi1>, vector<8x8xf32>
    %c0_17 = arith.constant 0 : index
    %c0_18 = arith.constant 0 : index
    %c0_19 = arith.constant 0 : index
    %34 = vector.load %arg6[%c0_17, %c0_18, %c0_19] : memref<2x1x32xf32, #tpu.memory_space<vmem>>, vector<1x1x32xf32>
    %35 = vector.shape_cast %34 : vector<1x1x32xf32> to vector<1x32xf32>
    %c0_20 = arith.constant 0 : index
    %c0_21 = arith.constant 0 : index
    %c0_22 = arith.constant 0 : index
    %36 = vector.load %arg7[%c0_20, %c0_21, %c0_22] : memref<2x1x32xf32, #tpu.memory_space<vmem>>, vector<1x1x32xf32>
    %37 = vector.shape_cast %36 : vector<1x1x32xf32> to vector<1x32xf32>
    %cst_23 = arith.constant dense<0.000000e+00> : vector<8xf32>
    %38 = vector.multi_reduction <add>, %27, %cst_23 [1] : vector<8x32xf32> to vector<8xf32>
    %39 = vector.shape_cast %38 : vector<8xf32> to vector<8x1xf32>
    %cst_24 = arith.constant 3.200000e+01 : f32
    %40 = vector.broadcast %cst_24 : f32 to vector<8x1xf32>
    %41 = arith.divf %39, %40 : vector<8x1xf32>
    %42 = vector.broadcast %41 : vector<8x1xf32> to vector<8x32xf32>
    %43 = arith.subf %27, %42 : vector<8x32xf32>
    %44 = arith.mulf %43, %43 : vector<8x32xf32>
    %cst_25 = arith.constant dense<0.000000e+00> : vector<8xf32>
    %45 = vector.multi_reduction <add>, %44, %cst_25 [1] : vector<8x32xf32> to vector<8xf32>
    %46 = vector.shape_cast %45 : vector<8xf32> to vector<8x1xf32>
    %cst_26 = arith.constant 3.200000e+01 : f32
    %47 = vector.broadcast %cst_26 : f32 to vector<8x1xf32>
    %48 = arith.divf %46, %47 : vector<8x1xf32>
    %cst_27 = arith.constant 9.99999974E-6 : f32
    %49 = vector.broadcast %cst_27 : f32 to vector<8x1xf32>
    %50 = arith.addf %48, %49 : vector<8x1xf32>
    %51 = math.rsqrt %50 : vector<8x1xf32>
    %52 = vector.broadcast %51 : vector<8x1xf32> to vector<8x32xf32>
    %53 = arith.mulf %43, %52 : vector<8x32xf32>
    %54 = vector.broadcast %35 : vector<1x32xf32> to vector<8x32xf32>
    %55 = arith.mulf %53, %54 : vector<8x32xf32>
    %56 = vector.broadcast %37 : vector<1x32xf32> to vector<8x32xf32>
    %57 = arith.addf %55, %56 : vector<8x32xf32>
    %58 = arith.truncf %57 : vector<8x32xf32> to vector<8x32xbf16>
    %c0_28 = arith.constant 0 : index
    %c0_29 = arith.constant 0 : index
    %c0_30 = arith.constant 0 : index
    %59 = vector.load %arg8[%c0_28, %c0_29, %c0_30] : memref<2x32x96xbf16, #tpu.memory_space<vmem>>, vector<1x32x96xbf16>
    %60 = vector.shape_cast %59 : vector<1x32x96xbf16> to vector<32x96xbf16>
    %cst_31 = arith.constant dense<0.000000e+00> : vector<8x96xf32>
    %61 = tpu.matmul %58, %60, %cst_31 {dimension_numbers = #tpu.dot_dimension_numbers<[1], [0], [0], [1], [0, 0, 1, 1], [], []>} : vector<8x32xbf16>, vector<32x96xbf16>, vector<8x96xf32> -> vector<8x96xf32>
    %c0_32 = arith.constant 0 : index
    %c0_33 = arith.constant 0 : index
    %c0_34 = arith.constant 0 : index
    %62 = vector.load %arg9[%c0_32, %c0_33, %c0_34] : memref<2x1x96xf32, #tpu.memory_space<vmem>>, vector<1x1x96xf32>
    %63 = vector.shape_cast %62 : vector<1x1x96xf32> to vector<1x96xf32>
    %64 = vector.broadcast %63 : vector<1x96xf32> to vector<8x96xf32>
    %65 = arith.addf %61, %64 : vector<8x96xf32>
    %c0_35 = arith.constant 0 : index
    %c0_36 = arith.constant 0 : index
    %c0_37 = arith.constant 0 : index
    %66 = vector.load %arg10[%c0_35, %c0_36, %c0_37] : memref<2x32x32xbf16, #tpu.memory_space<vmem>>, vector<1x32x32xbf16>
    %67 = vector.shape_cast %66 : vector<1x32x32xbf16> to vector<32x32xbf16>
    %cst_38 = arith.constant 0.000000e+00 : f32
    %68 = vector.broadcast %cst_38 : f32 to vector<8x32xf32>
    %69 = vector.extract_strided_slice %65 {offsets = [0, 0], sizes = [8, 8], strides = [1, 1]} : vector<8x96xf32> to vector<8x8xf32>
    %70 = arith.truncf %69 : vector<8x8xf32> to vector<8x8xbf16>
    %71 = vector.extract_strided_slice %65 {offsets = [0, 32], sizes = [8, 8], strides = [1, 1]} : vector<8x96xf32> to vector<8x8xf32>
    %72 = arith.truncf %71 : vector<8x8xf32> to vector<8x8xbf16>
    %73 = vector.extract_strided_slice %65 {offsets = [0, 64], sizes = [8, 8], strides = [1, 1]} : vector<8x96xf32> to vector<8x8xf32>
    %74 = arith.truncf %73 : vector<8x8xf32> to vector<8x8xbf16>
    "tpu.trace_start"() <{level = 10 : i32, message = "qd,kd->qk"}> : () -> ()
    %cst_39 = arith.constant dense<0.000000e+00> : vector<8x8xf32>
    %75 = tpu.matmul %70, %72, %cst_39 {dimension_numbers = #tpu.dot_dimension_numbers<[1], [1], [0], [0], [0, 0, 1, 0], [], []>} : vector<8x8xbf16>, vector<8x8xbf16>, vector<8x8xf32> -> vector<8x8xf32>
    "tpu.trace_stop"() : () -> ()
    %cst_40 = arith.constant 0.353553385 : f32
    %76 = vector.broadcast %cst_40 : f32 to vector<8x8xf32>
    %77 = arith.mulf %75, %76 : vector<8x8xf32>
    %78 = arith.addf %77, %33 : vector<8x8xf32>
    %cst_41 = arith.constant dense<0xFF800000> : vector<8xf32>
    %79 = vector.multi_reduction <maximumf>, %78, %cst_41 [1] : vector<8x8xf32> to vector<8xf32>
    %80 = vector.shape_cast %79 : vector<8xf32> to vector<8x1xf32>
    %81 = vector.broadcast %80 : vector<8x1xf32> to vector<8x8xf32>
    %82 = arith.subf %78, %81 : vector<8x8xf32>
    %83 = math.exp %82 : vector<8x8xf32>
    %cst_42 = arith.constant dense<0.000000e+00> : vector<8xf32>
    %84 = vector.multi_reduction <add>, %83, %cst_42 [1] : vector<8x8xf32> to vector<8xf32>
    %85 = vector.shape_cast %84 : vector<8xf32> to vector<8x1xf32>
    %86 = tpu.reciprocal %85 {approx = true} : vector<8x1xf32> -> vector<8x1xf32>
    %87 = vector.broadcast %86 : vector<8x1xf32> to vector<8x8xf32>
    %88 = arith.mulf %83, %87 : vector<8x8xf32>
    %89 = arith.truncf %88 : vector<8x8xf32> to vector<8x8xbf16>
    %cst_43 = arith.constant dense<0.000000e+00> : vector<8x8xf32>
    %90 = tpu.matmul %89, %74, %cst_43 {dimension_numbers = #tpu.dot_dimension_numbers<[1], [0], [0], [1], [0, 0, 1, 1], [], []>} : vector<8x8xbf16>, vector<8x8xbf16>, vector<8x8xf32> -> vector<8x8xf32>
    %91 = arith.truncf %90 : vector<8x8xf32> to vector<8x8xbf16>
    %92 = vector.extract_strided_slice %67 {offsets = [0, 0], sizes = [8, 32], strides = [1, 1]} : vector<32x32xbf16> to vector<8x32xbf16>
    %cst_44 = arith.constant dense<0.000000e+00> : vector<8x32xf32>
    %93 = tpu.matmul %91, %92, %cst_44 {dimension_numbers = #tpu.dot_dimension_numbers<[1], [0], [0], [1], [0, 0, 1, 1], [], []>} : vector<8x8xbf16>, vector<8x32xbf16>, vector<8x32xf32> -> vector<8x32xf32>
    %94 = arith.addf %68, %93 : vector<8x32xf32>
    %95 = vector.extract_strided_slice %65 {offsets = [0, 8], sizes = [8, 8], strides = [1, 1]} : vector<8x96xf32> to vector<8x8xf32>
    %96 = arith.truncf %95 : vector<8x8xf32> to vector<8x8xbf16>
    %97 = vector.extract_strided_slice %65 {offsets = [0, 40], sizes = [8, 8], strides = [1, 1]} : vector<8x96xf32> to vector<8x8xf32>
    %98 = arith.truncf %97 : vector<8x8xf32> to vector<8x8xbf16>
    %99 = vector.extract_strided_slice %65 {offsets = [0, 72], sizes = [8, 8], strides = [1, 1]} : vector<8x96xf32> to vector<8x8xf32>
    %100 = arith.truncf %99 : vector<8x8xf32> to vector<8x8xbf16>
    "tpu.trace_start"() <{level = 10 : i32, message = "qd,kd->qk"}> : () -> ()
    %cst_45 = arith.constant dense<0.000000e+00> : vector<8x8xf32>
    %101 = tpu.matmul %96, %98, %cst_45 {dimension_numbers = #tpu.dot_dimension_numbers<[1], [1], [0], [0], [0, 0, 1, 0], [], []>} : vector<8x8xbf16>, vector<8x8xbf16>, vector<8x8xf32> -> vector<8x8xf32>
    "tpu.trace_stop"() : () -> ()
    %cst_46 = arith.constant 0.353553385 : f32
    %102 = vector.broadcast %cst_46 : f32 to vector<8x8xf32>
    %103 = arith.mulf %101, %102 : vector<8x8xf32>
    %104 = arith.addf %103, %33 : vector<8x8xf32>
    %cst_47 = arith.constant dense<0xFF800000> : vector<8xf32>
    %105 = vector.multi_reduction <maximumf>, %104, %cst_47 [1] : vector<8x8xf32> to vector<8xf32>
    %106 = vector.shape_cast %105 : vector<8xf32> to vector<8x1xf32>
    %107 = vector.broadcast %106 : vector<8x1xf32> to vector<8x8xf32>
    %108 = arith.subf %104, %107 : vector<8x8xf32>
    %109 = math.exp %108 : vector<8x8xf32>
    %cst_48 = arith.constant dense<0.000000e+00> : vector<8xf32>
    %110 = vector.multi_reduction <add>, %109, %cst_48 [1] : vector<8x8xf32> to vector<8xf32>
    %111 = vector.shape_cast %110 : vector<8xf32> to vector<8x1xf32>
    %112 = tpu.reciprocal %111 {approx = true} : vector<8x1xf32> -> vector<8x1xf32>
    %113 = vector.broadcast %112 : vector<8x1xf32> to vector<8x8xf32>
    %114 = arith.mulf %109, %113 : vector<8x8xf32>
    %115 = arith.truncf %114 : vector<8x8xf32> to vector<8x8xbf16>
    %cst_49 = arith.constant dense<0.000000e+00> : vector<8x8xf32>
    %116 = tpu.matmul %115, %100, %cst_49 {dimension_numbers = #tpu.dot_dimension_numbers<[1], [0], [0], [1], [0, 0, 1, 1], [], []>} : vector<8x8xbf16>, vector<8x8xbf16>, vector<8x8xf32> -> vector<8x8xf32>
    %117 = arith.truncf %116 : vector<8x8xf32> to vector<8x8xbf16>
    %118 = vector.extract_strided_slice %67 {offsets = [8, 0], sizes = [8, 32], strides = [1, 1]} : vector<32x32xbf16> to vector<8x32xbf16>
    %cst_50 = arith.constant dense<0.000000e+00> : vector<8x32xf32>
    %119 = tpu.matmul %117, %118, %cst_50 {dimension_numbers = #tpu.dot_dimension_numbers<[1], [0], [0], [1], [0, 0, 1, 1], [], []>} : vector<8x8xbf16>, vector<8x32xbf16>, vector<8x32xf32> -> vector<8x32xf32>
    %120 = arith.addf %94, %119 : vector<8x32xf32>
    %121 = vector.extract_strided_slice %65 {offsets = [0, 16], sizes = [8, 8], strides = [1, 1]} : vector<8x96xf32> to vector<8x8xf32>
    %122 = arith.truncf %121 : vector<8x8xf32> to vector<8x8xbf16>
    %123 = vector.extract_strided_slice %65 {offsets = [0, 48], sizes = [8, 8], strides = [1, 1]} : vector<8x96xf32> to vector<8x8xf32>
    %124 = arith.truncf %123 : vector<8x8xf32> to vector<8x8xbf16>
    %125 = vector.extract_strided_slice %65 {offsets = [0, 80], sizes = [8, 8], strides = [1, 1]} : vector<8x96xf32> to vector<8x8xf32>
    %126 = arith.truncf %125 : vector<8x8xf32> to vector<8x8xbf16>
    "tpu.trace_start"() <{level = 10 : i32, message = "qd,kd->qk"}> : () -> ()
    %cst_51 = arith.constant dense<0.000000e+00> : vector<8x8xf32>
    %127 = tpu.matmul %122, %124, %cst_51 {dimension_numbers = #tpu.dot_dimension_numbers<[1], [1], [0], [0], [0, 0, 1, 0], [], []>} : vector<8x8xbf16>, vector<8x8xbf16>, vector<8x8xf32> -> vector<8x8xf32>
    "tpu.trace_stop"() : () -> ()
    %cst_52 = arith.constant 0.353553385 : f32
    %128 = vector.broadcast %cst_52 : f32 to vector<8x8xf32>
    %129 = arith.mulf %127, %128 : vector<8x8xf32>
    %130 = arith.addf %129, %33 : vector<8x8xf32>
    %cst_53 = arith.constant dense<0xFF800000> : vector<8xf32>
    %131 = vector.multi_reduction <maximumf>, %130, %cst_53 [1] : vector<8x8xf32> to vector<8xf32>
    %132 = vector.shape_cast %131 : vector<8xf32> to vector<8x1xf32>
    %133 = vector.broadcast %132 : vector<8x1xf32> to vector<8x8xf32>
    %134 = arith.subf %130, %133 : vector<8x8xf32>
    %135 = math.exp %134 : vector<8x8xf32>
    %cst_54 = arith.constant dense<0.000000e+00> : vector<8xf32>
    %136 = vector.multi_reduction <add>, %135, %cst_54 [1] : vector<8x8xf32> to vector<8xf32>
    %137 = vector.shape_cast %136 : vector<8xf32> to vector<8x1xf32>
    %138 = tpu.reciprocal %137 {approx = true} : vector<8x1xf32> -> vector<8x1xf32>
    %139 = vector.broadcast %138 : vector<8x1xf32> to vector<8x8xf32>
    %140 = arith.mulf %135, %139 : vector<8x8xf32>
    %141 = arith.truncf %140 : vector<8x8xf32> to vector<8x8xbf16>
    %cst_55 = arith.constant dense<0.000000e+00> : vector<8x8xf32>
    %142 = tpu.matmul %141, %126, %cst_55 {dimension_numbers = #tpu.dot_dimension_numbers<[1], [0], [0], [1], [0, 0, 1, 1], [], []>} : vector<8x8xbf16>, vector<8x8xbf16>, vector<8x8xf32> -> vector<8x8xf32>
    %143 = arith.truncf %142 : vector<8x8xf32> to vector<8x8xbf16>
    %144 = vector.extract_strided_slice %67 {offsets = [16, 0], sizes = [8, 32], strides = [1, 1]} : vector<32x32xbf16> to vector<8x32xbf16>
    %cst_56 = arith.constant dense<0.000000e+00> : vector<8x32xf32>
    %145 = tpu.matmul %143, %144, %cst_56 {dimension_numbers = #tpu.dot_dimension_numbers<[1], [0], [0], [1], [0, 0, 1, 1], [], []>} : vector<8x8xbf16>, vector<8x32xbf16>, vector<8x32xf32> -> vector<8x32xf32>
    %146 = arith.addf %120, %145 : vector<8x32xf32>
    %147 = vector.extract_strided_slice %65 {offsets = [0, 24], sizes = [8, 8], strides = [1, 1]} : vector<8x96xf32> to vector<8x8xf32>
    %148 = arith.truncf %147 : vector<8x8xf32> to vector<8x8xbf16>
    %149 = vector.extract_strided_slice %65 {offsets = [0, 56], sizes = [8, 8], strides = [1, 1]} : vector<8x96xf32> to vector<8x8xf32>
    %150 = arith.truncf %149 : vector<8x8xf32> to vector<8x8xbf16>
    %151 = vector.extract_strided_slice %65 {offsets = [0, 88], sizes = [8, 8], strides = [1, 1]} : vector<8x96xf32> to vector<8x8xf32>
    %152 = arith.truncf %151 : vector<8x8xf32> to vector<8x8xbf16>
    "tpu.trace_start"() <{level = 10 : i32, message = "qd,kd->qk"}> : () -> ()
    %cst_57 = arith.constant dense<0.000000e+00> : vector<8x8xf32>
    %153 = tpu.matmul %148, %150, %cst_57 {dimension_numbers = #tpu.dot_dimension_numbers<[1], [1], [0], [0], [0, 0, 1, 0], [], []>} : vector<8x8xbf16>, vector<8x8xbf16>, vector<8x8xf32> -> vector<8x8xf32>
    "tpu.trace_stop"() : () -> ()
    %cst_58 = arith.constant 0.353553385 : f32
    %154 = vector.broadcast %cst_58 : f32 to vector<8x8xf32>
    %155 = arith.mulf %153, %154 : vector<8x8xf32>
    %156 = arith.addf %155, %33 : vector<8x8xf32>
    %cst_59 = arith.constant dense<0xFF800000> : vector<8xf32>
    %157 = vector.multi_reduction <maximumf>, %156, %cst_59 [1] : vector<8x8xf32> to vector<8xf32>
    %158 = vector.shape_cast %157 : vector<8xf32> to vector<8x1xf32>
    %159 = vector.broadcast %158 : vector<8x1xf32> to vector<8x8xf32>
    %160 = arith.subf %156, %159 : vector<8x8xf32>
    %161 = math.exp %160 : vector<8x8xf32>
    %cst_60 = arith.constant dense<0.000000e+00> : vector<8xf32>
    %162 = vector.multi_reduction <add>, %161, %cst_60 [1] : vector<8x8xf32> to vector<8xf32>
    %163 = vector.shape_cast %162 : vector<8xf32> to vector<8x1xf32>
    %164 = tpu.reciprocal %163 {approx = true} : vector<8x1xf32> -> vector<8x1xf32>
    %165 = vector.broadcast %164 : vector<8x1xf32> to vector<8x8xf32>
    %166 = arith.mulf %161, %165 : vector<8x8xf32>
    %167 = arith.truncf %166 : vector<8x8xf32> to vector<8x8xbf16>
    %cst_61 = arith.constant dense<0.000000e+00> : vector<8x8xf32>
    %168 = tpu.matmul %167, %152, %cst_61 {dimension_numbers = #tpu.dot_dimension_numbers<[1], [0], [0], [1], [0, 0, 1, 1], [], []>} : vector<8x8xbf16>, vector<8x8xbf16>, vector<8x8xf32> -> vector<8x8xf32>
    %169 = arith.truncf %168 : vector<8x8xf32> to vector<8x8xbf16>
    %170 = vector.extract_strided_slice %67 {offsets = [24, 0], sizes = [8, 32], strides = [1, 1]} : vector<32x32xbf16> to vector<8x32xbf16>
    %cst_62 = arith.constant dense<0.000000e+00> : vector<8x32xf32>
    %171 = tpu.matmul %169, %170, %cst_62 {dimension_numbers = #tpu.dot_dimension_numbers<[1], [0], [0], [1], [0, 0, 1, 1], [], []>} : vector<8x8xbf16>, vector<8x32xbf16>, vector<8x32xf32> -> vector<8x32xf32>
    %172 = arith.addf %146, %171 : vector<8x32xf32>
    %173 = arith.addf %27, %172 : vector<8x32xf32>
    %c0_63 = arith.constant 0 : index
    %c0_64 = arith.constant 0 : index
    %c0_65 = arith.constant 0 : index
    %174 = vector.load %arg11[%c0_63, %c0_64, %c0_65] : memref<2x1x32xf32, #tpu.memory_space<vmem>>, vector<1x1x32xf32>
    %175 = vector.shape_cast %174 : vector<1x1x32xf32> to vector<1x32xf32>
    %176 = vector.broadcast %175 : vector<1x32xf32> to vector<8x32xf32>
    %177 = arith.addf %173, %176 : vector<8x32xf32>
    %c0_66 = arith.constant 0 : index
    %c0_67 = arith.constant 0 : index
    %c0_68 = arith.constant 0 : index
    %178 = vector.load %arg12[%c0_66, %c0_67, %c0_68] : memref<2x1x32xf32, #tpu.memory_space<vmem>>, vector<1x1x32xf32>
    %179 = vector.shape_cast %178 : vector<1x1x32xf32> to vector<1x32xf32>
    %c0_69 = arith.constant 0 : index
    %c0_70 = arith.constant 0 : index
    %c0_71 = arith.constant 0 : index
    %180 = vector.load %arg13[%c0_69, %c0_70, %c0_71] : memref<2x1x32xf32, #tpu.memory_space<vmem>>, vector<1x1x32xf32>
    %181 = vector.shape_cast %180 : vector<1x1x32xf32> to vector<1x32xf32>
    %cst_72 = arith.constant dense<0.000000e+00> : vector<8xf32>
    %182 = vector.multi_reduction <add>, %177, %cst_72 [1] : vector<8x32xf32> to vector<8xf32>
    %183 = vector.shape_cast %182 : vector<8xf32> to vector<8x1xf32>
    %cst_73 = arith.constant 3.200000e+01 : f32
    %184 = vector.broadcast %cst_73 : f32 to vector<8x1xf32>
    %185 = arith.divf %183, %184 : vector<8x1xf32>
    %186 = vector.broadcast %185 : vector<8x1xf32> to vector<8x32xf32>
    %187 = arith.subf %177, %186 : vector<8x32xf32>
    %188 = arith.mulf %187, %187 : vector<8x32xf32>
    %cst_74 = arith.constant dense<0.000000e+00> : vector<8xf32>
    %189 = vector.multi_reduction <add>, %188, %cst_74 [1] : vector<8x32xf32> to vector<8xf32>
    %190 = vector.shape_cast %189 : vector<8xf32> to vector<8x1xf32>
    %cst_75 = arith.constant 3.200000e+01 : f32
    %191 = vector.broadcast %cst_75 : f32 to vector<8x1xf32>
    %192 = arith.divf %190, %191 : vector<8x1xf32>
    %cst_76 = arith.constant 9.99999974E-6 : f32
    %193 = vector.broadcast %cst_76 : f32 to vector<8x1xf32>
    %194 = arith.addf %192, %193 : vector<8x1xf32>
    %195 = math.rsqrt %194 : vector<8x1xf32>
    %196 = vector.broadcast %195 : vector<8x1xf32> to vector<8x32xf32>
    %197 = arith.mulf %187, %196 : vector<8x32xf32>
    %198 = vector.broadcast %179 : vector<1x32xf32> to vector<8x32xf32>
    %199 = arith.mulf %197, %198 : vector<8x32xf32>
    %200 = vector.broadcast %181 : vector<1x32xf32> to vector<8x32xf32>
    %201 = arith.addf %199, %200 : vector<8x32xf32>
    %202 = arith.truncf %201 : vector<8x32xf32> to vector<8x32xbf16>
    %c0_77 = arith.constant 0 : index
    %c0_78 = arith.constant 0 : index
    %c0_79 = arith.constant 0 : index
    %203 = vector.load %arg14[%c0_77, %c0_78, %c0_79] : memref<2x32x128xbf16, #tpu.memory_space<vmem>>, vector<1x32x128xbf16>
    %204 = vector.shape_cast %203 : vector<1x32x128xbf16> to vector<32x128xbf16>
    %cst_80 = arith.constant dense<0.000000e+00> : vector<8x128xf32>
    %205 = tpu.matmul %202, %204, %cst_80 {dimension_numbers = #tpu.dot_dimension_numbers<[1], [0], [0], [1], [0, 0, 1, 1], [], []>} : vector<8x32xbf16>, vector<32x128xbf16>, vector<8x128xf32> -> vector<8x128xf32>
    %c0_81 = arith.constant 0 : index
    %c0_82 = arith.constant 0 : index
    %c0_83 = arith.constant 0 : index
    %206 = vector.load %arg15[%c0_81, %c0_82, %c0_83] : memref<2x1x128xf32, #tpu.memory_space<vmem>>, vector<1x1x128xf32>
    %207 = vector.shape_cast %206 : vector<1x1x128xf32> to vector<1x128xf32>
    %208 = vector.broadcast %207 : vector<1x128xf32> to vector<8x128xf32>
    %209 = arith.addf %205, %208 : vector<8x128xf32>
    %cst_84 = arith.constant 1.702000e+00 : f32
    %210 = vector.broadcast %cst_84 : f32 to vector<8x128xf32>
    %211 = arith.mulf %210, %209 : vector<8x128xf32>
    %212 = arith.negf %211 : vector<8x128xf32>
    %213 = math.exp %212 : vector<8x128xf32>
    %cst_85 = arith.constant 1.000000e+00 : f32
    %214 = vector.broadcast %cst_85 : f32 to vector<8x128xf32>
    %215 = arith.addf %214, %213 : vector<8x128xf32>
    %216 = arith.divf %214, %215 : vector<8x128xf32>
    %217 = arith.mulf %209, %216 : vector<8x128xf32>
    %218 = arith.truncf %217 : vector<8x128xf32> to vector<8x128xbf16>
    %c0_86 = arith.constant 0 : index
    %c0_87 = arith.constant 0 : index
    %c0_88 = arith.constant 0 : index
    %219 = vector.load %arg16[%c0_86, %c0_87, %c0_88] : memref<2x128x32xbf16, #tpu.memory_space<vmem>>, vector<1x128x32xbf16>
    %220 = vector.shape_cast %219 : vector<1x128x32xbf16> to vector<128x32xbf16>
    %cst_89 = arith.constant dense<0.000000e+00> : vector<8x32xf32>
    %221 = tpu.matmul %218, %220, %cst_89 {dimension_numbers = #tpu.dot_dimension_numbers<[1], [0], [0], [1], [0, 0, 1, 1], [], []>} : vector<8x128xbf16>, vector<128x32xbf16>, vector<8x32xf32> -> vector<8x32xf32>
    %c0_90 = arith.constant 0 : index
    %c0_91 = arith.constant 0 : index
    %c0_92 = arith.constant 0 : index
    %222 = vector.load %arg17[%c0_90, %c0_91, %c0_92] : memref<2x1x32xf32, #tpu.memory_space<vmem>>, vector<1x1x32xf32>
    %223 = vector.shape_cast %222 : vector<1x1x32xf32> to vector<1x32xf32>
    %224 = vector.broadcast %223 : vector<1x32xf32> to vector<8x32xf32>
    %225 = arith.addf %221, %224 : vector<8x32xf32>
    %226 = arith.addf %177, %225 : vector<8x32xf32>
    %c1 = arith.constant 1 : index
    %c0_93 = arith.constant 0 : index
    %c0_94 = arith.constant 0 : index
    %227 = vector.load %arg6[%c1, %c0_93, %c0_94] : memref<2x1x32xf32, #tpu.memory_space<vmem>>, vector<1x1x32xf32>
    %228 = vector.shape_cast %227 : vector<1x1x32xf32> to vector<1x32xf32>
    %c1_95 = arith.constant 1 : index
    %c0_96 = arith.constant 0 : index
    %c0_97 = arith.constant 0 : index
    %229 = vector.load %arg7[%c1_95, %c0_96, %c0_97] : memref<2x1x32xf32, #tpu.memory_space<vmem>>, vector<1x1x32xf32>
    %230 = vector.shape_cast %229 : vector<1x1x32xf32> to vector<1x32xf32>
    %cst_98 = arith.constant dense<0.000000e+00> : vector<8xf32>
    %231 = vector.multi_reduction <add>, %226, %cst_98 [1] : vector<8x32xf32> to vector<8xf32>
    %232 = vector.shape_cast %231 : vector<8xf32> to vector<8x1xf32>
    %cst_99 = arith.constant 3.200000e+01 : f32
    %233 = vector.broadcast %cst_99 : f32 to vector<8x1xf32>
    %234 = arith.divf %232, %233 : vector<8x1xf32>
    %235 = vector.broadcast %234 : vector<8x1xf32> to vector<8x32xf32>
    %236 = arith.subf %226, %235 : vector<8x32xf32>
    %237 = arith.mulf %236, %236 : vector<8x32xf32>
    %cst_100 = arith.constant dense<0.000000e+00> : vector<8xf32>
    %238 = vector.multi_reduction <add>, %237, %cst_100 [1] : vector<8x32xf32> to vector<8xf32>
    %239 = vector.shape_cast %238 : vector<8xf32> to vector<8x1xf32>
    %cst_101 = arith.constant 3.200000e+01 : f32
    %240 = vector.broadcast %cst_101 : f32 to vector<8x1xf32>
    %241 = arith.divf %239, %240 : vector<8x1xf32>
    %cst_102 = arith.constant 9.99999974E-6 : f32
    %242 = vector.broadcast %cst_102 : f32 to vector<8x1xf32>
    %243 = arith.addf %241, %242 : vector<8x1xf32>
    %244 = math.rsqrt %243 : vector<8x1xf32>
    %245 = vector.broadcast %244 : vector<8x1xf32> to vector<8x32xf32>
    %246 = arith.mulf %236, %245 : vector<8x32xf32>
    %247 = vector.broadcast %228 : vector<1x32xf32> to vector<8x32xf32>
    %248 = arith.mulf %246, %247 : vector<8x32xf32>
    %249 = vector.broadcast %230 : vector<1x32xf32> to vector<8x32xf32>
    %250 = arith.addf %248, %249 : vector<8x32xf32>
    %251 = arith.truncf %250 : vector<8x32xf32> to vector<8x32xbf16>
    %c1_103 = arith.constant 1 : index
    %c0_104 = arith.constant 0 : index
    %c0_105 = arith.constant 0 : index
    %252 = vector.load %arg8[%c1_103, %c0_104, %c0_105] : memref<2x32x96xbf16, #tpu.memory_space<vmem>>, vector<1x32x96xbf16>
    %253 = vector.shape_cast %252 : vector<1x32x96xbf16> to vector<32x96xbf16>
    %cst_106 = arith.constant dense<0.000000e+00> : vector<8x96xf32>
    %254 = tpu.matmul %251, %253, %cst_106 {dimension_numbers = #tpu.dot_dimension_numbers<[1], [0], [0], [1], [0, 0, 1, 1], [], []>} : vector<8x32xbf16>, vector<32x96xbf16>, vector<8x96xf32> -> vector<8x96xf32>
    %c1_107 = arith.constant 1 : index
    %c0_108 = arith.constant 0 : index
    %c0_109 = arith.constant 0 : index
    %255 = vector.load %arg9[%c1_107, %c0_108, %c0_109] : memref<2x1x96xf32, #tpu.memory_space<vmem>>, vector<1x1x96xf32>
    %256 = vector.shape_cast %255 : vector<1x1x96xf32> to vector<1x96xf32>
    %257 = vector.broadcast %256 : vector<1x96xf32> to vector<8x96xf32>
    %258 = arith.addf %254, %257 : vector<8x96xf32>
    %c1_110 = arith.constant 1 : index
    %c0_111 = arith.constant 0 : index
    %c0_112 = arith.constant 0 : index
    %259 = vector.load %arg10[%c1_110, %c0_111, %c0_112] : memref<2x32x32xbf16, #tpu.memory_space<vmem>>, vector<1x32x32xbf16>
    %260 = vector.shape_cast %259 : vector<1x32x32xbf16> to vector<32x32xbf16>
    %cst_113 = arith.constant 0.000000e+00 : f32
    %261 = vector.broadcast %cst_113 : f32 to vector<8x32xf32>
    %262 = vector.extract_strided_slice %258 {offsets = [0, 0], sizes = [8, 8], strides = [1, 1]} : vector<8x96xf32> to vector<8x8xf32>
    %263 = arith.truncf %262 : vector<8x8xf32> to vector<8x8xbf16>
    %264 = vector.extract_strided_slice %258 {offsets = [0, 32], sizes = [8, 8], strides = [1, 1]} : vector<8x96xf32> to vector<8x8xf32>
    %265 = arith.truncf %264 : vector<8x8xf32> to vector<8x8xbf16>
    %266 = vector.extract_strided_slice %258 {offsets = [0, 64], sizes = [8, 8], strides = [1, 1]} : vector<8x96xf32> to vector<8x8xf32>
    %267 = arith.truncf %266 : vector<8x8xf32> to vector<8x8xbf16>
    "tpu.trace_start"() <{level = 10 : i32, message = "qd,kd->qk"}> : () -> ()
    %cst_114 = arith.constant dense<0.000000e+00> : vector<8x8xf32>
    %268 = tpu.matmul %263, %265, %cst_114 {dimension_numbers = #tpu.dot_dimension_numbers<[1], [1], [0], [0], [0, 0, 1, 0], [], []>} : vector<8x8xbf16>, vector<8x8xbf16>, vector<8x8xf32> -> vector<8x8xf32>
    "tpu.trace_stop"() : () -> ()
    %cst_115 = arith.constant 0.353553385 : f32
    %269 = vector.broadcast %cst_115 : f32 to vector<8x8xf32>
    %270 = arith.mulf %268, %269 : vector<8x8xf32>
    %271 = arith.addf %270, %33 : vector<8x8xf32>
    %cst_116 = arith.constant dense<0xFF800000> : vector<8xf32>
    %272 = vector.multi_reduction <maximumf>, %271, %cst_116 [1] : vector<8x8xf32> to vector<8xf32>
    %273 = vector.shape_cast %272 : vector<8xf32> to vector<8x1xf32>
    %274 = vector.broadcast %273 : vector<8x1xf32> to vector<8x8xf32>
    %275 = arith.subf %271, %274 : vector<8x8xf32>
    %276 = math.exp %275 : vector<8x8xf32>
    %cst_117 = arith.constant dense<0.000000e+00> : vector<8xf32>
    %277 = vector.multi_reduction <add>, %276, %cst_117 [1] : vector<8x8xf32> to vector<8xf32>
    %278 = vector.shape_cast %277 : vector<8xf32> to vector<8x1xf32>
    %279 = tpu.reciprocal %278 {approx = true} : vector<8x1xf32> -> vector<8x1xf32>
    %280 = vector.broadcast %279 : vector<8x1xf32> to vector<8x8xf32>
    %281 = arith.mulf %276, %280 : vector<8x8xf32>
    %282 = arith.truncf %281 : vector<8x8xf32> to vector<8x8xbf16>
    %cst_118 = arith.constant dense<0.000000e+00> : vector<8x8xf32>
    %283 = tpu.matmul %282, %267, %cst_118 {dimension_numbers = #tpu.dot_dimension_numbers<[1], [0], [0], [1], [0, 0, 1, 1], [], []>} : vector<8x8xbf16>, vector<8x8xbf16>, vector<8x8xf32> -> vector<8x8xf32>
    %284 = arith.truncf %283 : vector<8x8xf32> to vector<8x8xbf16>
    %285 = vector.extract_strided_slice %260 {offsets = [0, 0], sizes = [8, 32], strides = [1, 1]} : vector<32x32xbf16> to vector<8x32xbf16>
    %cst_119 = arith.constant dense<0.000000e+00> : vector<8x32xf32>
    %286 = tpu.matmul %284, %285, %cst_119 {dimension_numbers = #tpu.dot_dimension_numbers<[1], [0], [0], [1], [0, 0, 1, 1], [], []>} : vector<8x8xbf16>, vector<8x32xbf16>, vector<8x32xf32> -> vector<8x32xf32>
    %287 = arith.addf %261, %286 : vector<8x32xf32>
    %288 = vector.extract_strided_slice %258 {offsets = [0, 8], sizes = [8, 8], strides = [1, 1]} : vector<8x96xf32> to vector<8x8xf32>
    %289 = arith.truncf %288 : vector<8x8xf32> to vector<8x8xbf16>
    %290 = vector.extract_strided_slice %258 {offsets = [0, 40], sizes = [8, 8], strides = [1, 1]} : vector<8x96xf32> to vector<8x8xf32>
    %291 = arith.truncf %290 : vector<8x8xf32> to vector<8x8xbf16>
    %292 = vector.extract_strided_slice %258 {offsets = [0, 72], sizes = [8, 8], strides = [1, 1]} : vector<8x96xf32> to vector<8x8xf32>
    %293 = arith.truncf %292 : vector<8x8xf32> to vector<8x8xbf16>
    "tpu.trace_start"() <{level = 10 : i32, message = "qd,kd->qk"}> : () -> ()
    %cst_120 = arith.constant dense<0.000000e+00> : vector<8x8xf32>
    %294 = tpu.matmul %289, %291, %cst_120 {dimension_numbers = #tpu.dot_dimension_numbers<[1], [1], [0], [0], [0, 0, 1, 0], [], []>} : vector<8x8xbf16>, vector<8x8xbf16>, vector<8x8xf32> -> vector<8x8xf32>
    "tpu.trace_stop"() : () -> ()
    %cst_121 = arith.constant 0.353553385 : f32
    %295 = vector.broadcast %cst_121 : f32 to vector<8x8xf32>
    %296 = arith.mulf %294, %295 : vector<8x8xf32>
    %297 = arith.addf %296, %33 : vector<8x8xf32>
    %cst_122 = arith.constant dense<0xFF800000> : vector<8xf32>
    %298 = vector.multi_reduction <maximumf>, %297, %cst_122 [1] : vector<8x8xf32> to vector<8xf32>
    %299 = vector.shape_cast %298 : vector<8xf32> to vector<8x1xf32>
    %300 = vector.broadcast %299 : vector<8x1xf32> to vector<8x8xf32>
    %301 = arith.subf %297, %300 : vector<8x8xf32>
    %302 = math.exp %301 : vector<8x8xf32>
    %cst_123 = arith.constant dense<0.000000e+00> : vector<8xf32>
    %303 = vector.multi_reduction <add>, %302, %cst_123 [1] : vector<8x8xf32> to vector<8xf32>
    %304 = vector.shape_cast %303 : vector<8xf32> to vector<8x1xf32>
    %305 = tpu.reciprocal %304 {approx = true} : vector<8x1xf32> -> vector<8x1xf32>
    %306 = vector.broadcast %305 : vector<8x1xf32> to vector<8x8xf32>
    %307 = arith.mulf %302, %306 : vector<8x8xf32>
    %308 = arith.truncf %307 : vector<8x8xf32> to vector<8x8xbf16>
    %cst_124 = arith.constant dense<0.000000e+00> : vector<8x8xf32>
    %309 = tpu.matmul %308, %293, %cst_124 {dimension_numbers = #tpu.dot_dimension_numbers<[1], [0], [0], [1], [0, 0, 1, 1], [], []>} : vector<8x8xbf16>, vector<8x8xbf16>, vector<8x8xf32> -> vector<8x8xf32>
    %310 = arith.truncf %309 : vector<8x8xf32> to vector<8x8xbf16>
    %311 = vector.extract_strided_slice %260 {offsets = [8, 0], sizes = [8, 32], strides = [1, 1]} : vector<32x32xbf16> to vector<8x32xbf16>
    %cst_125 = arith.constant dense<0.000000e+00> : vector<8x32xf32>
    %312 = tpu.matmul %310, %311, %cst_125 {dimension_numbers = #tpu.dot_dimension_numbers<[1], [0], [0], [1], [0, 0, 1, 1], [], []>} : vector<8x8xbf16>, vector<8x32xbf16>, vector<8x32xf32> -> vector<8x32xf32>
    %313 = arith.addf %287, %312 : vector<8x32xf32>
    %314 = vector.extract_strided_slice %258 {offsets = [0, 16], sizes = [8, 8], strides = [1, 1]} : vector<8x96xf32> to vector<8x8xf32>
    %315 = arith.truncf %314 : vector<8x8xf32> to vector<8x8xbf16>
    %316 = vector.extract_strided_slice %258 {offsets = [0, 48], sizes = [8, 8], strides = [1, 1]} : vector<8x96xf32> to vector<8x8xf32>
    %317 = arith.truncf %316 : vector<8x8xf32> to vector<8x8xbf16>
    %318 = vector.extract_strided_slice %258 {offsets = [0, 80], sizes = [8, 8], strides = [1, 1]} : vector<8x96xf32> to vector<8x8xf32>
    %319 = arith.truncf %318 : vector<8x8xf32> to vector<8x8xbf16>
    "tpu.trace_start"() <{level = 10 : i32, message = "qd,kd->qk"}> : () -> ()
    %cst_126 = arith.constant dense<0.000000e+00> : vector<8x8xf32>
    %320 = tpu.matmul %315, %317, %cst_126 {dimension_numbers = #tpu.dot_dimension_numbers<[1], [1], [0], [0], [0, 0, 1, 0], [], []>} : vector<8x8xbf16>, vector<8x8xbf16>, vector<8x8xf32> -> vector<8x8xf32>
    "tpu.trace_stop"() : () -> ()
    %cst_127 = arith.constant 0.353553385 : f32
    %321 = vector.broadcast %cst_127 : f32 to vector<8x8xf32>
    %322 = arith.mulf %320, %321 : vector<8x8xf32>
    %323 = arith.addf %322, %33 : vector<8x8xf32>
    %cst_128 = arith.constant dense<0xFF800000> : vector<8xf32>
    %324 = vector.multi_reduction <maximumf>, %323, %cst_128 [1] : vector<8x8xf32> to vector<8xf32>
    %325 = vector.shape_cast %324 : vector<8xf32> to vector<8x1xf32>
    %326 = vector.broadcast %325 : vector<8x1xf32> to vector<8x8xf32>
    %327 = arith.subf %323, %326 : vector<8x8xf32>
    %328 = math.exp %327 : vector<8x8xf32>
    %cst_129 = arith.constant dense<0.000000e+00> : vector<8xf32>
    %329 = vector.multi_reduction <add>, %328, %cst_129 [1] : vector<8x8xf32> to vector<8xf32>
    %330 = vector.shape_cast %329 : vector<8xf32> to vector<8x1xf32>
    %331 = tpu.reciprocal %330 {approx = true} : vector<8x1xf32> -> vector<8x1xf32>
    %332 = vector.broadcast %331 : vector<8x1xf32> to vector<8x8xf32>
    %333 = arith.mulf %328, %332 : vector<8x8xf32>
    %334 = arith.truncf %333 : vector<8x8xf32> to vector<8x8xbf16>
    %cst_130 = arith.constant dense<0.000000e+00> : vector<8x8xf32>
    %335 = tpu.matmul %334, %319, %cst_130 {dimension_numbers = #tpu.dot_dimension_numbers<[1], [0], [0], [1], [0, 0, 1, 1], [], []>} : vector<8x8xbf16>, vector<8x8xbf16>, vector<8x8xf32> -> vector<8x8xf32>
    %336 = arith.truncf %335 : vector<8x8xf32> to vector<8x8xbf16>
    %337 = vector.extract_strided_slice %260 {offsets = [16, 0], sizes = [8, 32], strides = [1, 1]} : vector<32x32xbf16> to vector<8x32xbf16>
    %cst_131 = arith.constant dense<0.000000e+00> : vector<8x32xf32>
    %338 = tpu.matmul %336, %337, %cst_131 {dimension_numbers = #tpu.dot_dimension_numbers<[1], [0], [0], [1], [0, 0, 1, 1], [], []>} : vector<8x8xbf16>, vector<8x32xbf16>, vector<8x32xf32> -> vector<8x32xf32>
    %339 = arith.addf %313, %338 : vector<8x32xf32>
    %340 = vector.extract_strided_slice %258 {offsets = [0, 24], sizes = [8, 8], strides = [1, 1]} : vector<8x96xf32> to vector<8x8xf32>
    %341 = arith.truncf %340 : vector<8x8xf32> to vector<8x8xbf16>
    %342 = vector.extract_strided_slice %258 {offsets = [0, 56], sizes = [8, 8], strides = [1, 1]} : vector<8x96xf32> to vector<8x8xf32>
    %343 = arith.truncf %342 : vector<8x8xf32> to vector<8x8xbf16>
    %344 = vector.extract_strided_slice %258 {offsets = [0, 88], sizes = [8, 8], strides = [1, 1]} : vector<8x96xf32> to vector<8x8xf32>
    %345 = arith.truncf %344 : vector<8x8xf32> to vector<8x8xbf16>
    "tpu.trace_start"() <{level = 10 : i32, message = "qd,kd->qk"}> : () -> ()
    %cst_132 = arith.constant dense<0.000000e+00> : vector<8x8xf32>
    %346 = tpu.matmul %341, %343, %cst_132 {dimension_numbers = #tpu.dot_dimension_numbers<[1], [1], [0], [0], [0, 0, 1, 0], [], []>} : vector<8x8xbf16>, vector<8x8xbf16>, vector<8x8xf32> -> vector<8x8xf32>
    "tpu.trace_stop"() : () -> ()
    %cst_133 = arith.constant 0.353553385 : f32
    %347 = vector.broadcast %cst_133 : f32 to vector<8x8xf32>
    %348 = arith.mulf %346, %347 : vector<8x8xf32>
    %349 = arith.addf %348, %33 : vector<8x8xf32>
    %cst_134 = arith.constant dense<0xFF800000> : vector<8xf32>
    %350 = vector.multi_reduction <maximumf>, %349, %cst_134 [1] : vector<8x8xf32> to vector<8xf32>
    %351 = vector.shape_cast %350 : vector<8xf32> to vector<8x1xf32>
    %352 = vector.broadcast %351 : vector<8x1xf32> to vector<8x8xf32>
    %353 = arith.subf %349, %352 : vector<8x8xf32>
    %354 = math.exp %353 : vector<8x8xf32>
    %cst_135 = arith.constant dense<0.000000e+00> : vector<8xf32>
    %355 = vector.multi_reduction <add>, %354, %cst_135 [1] : vector<8x8xf32> to vector<8xf32>
    %356 = vector.shape_cast %355 : vector<8xf32> to vector<8x1xf32>
    %357 = tpu.reciprocal %356 {approx = true} : vector<8x1xf32> -> vector<8x1xf32>
    %358 = vector.broadcast %357 : vector<8x1xf32> to vector<8x8xf32>
    %359 = arith.mulf %354, %358 : vector<8x8xf32>
    %360 = arith.truncf %359 : vector<8x8xf32> to vector<8x8xbf16>
    %cst_136 = arith.constant dense<0.000000e+00> : vector<8x8xf32>
    %361 = tpu.matmul %360, %345, %cst_136 {dimension_numbers = #tpu.dot_dimension_numbers<[1], [0], [0], [1], [0, 0, 1, 1], [], []>} : vector<8x8xbf16>, vector<8x8xbf16>, vector<8x8xf32> -> vector<8x8xf32>
    %362 = arith.truncf %361 : vector<8x8xf32> to vector<8x8xbf16>
    %363 = vector.extract_strided_slice %260 {offsets = [24, 0], sizes = [8, 32], strides = [1, 1]} : vector<32x32xbf16> to vector<8x32xbf16>
    %cst_137 = arith.constant dense<0.000000e+00> : vector<8x32xf32>
    %364 = tpu.matmul %362, %363, %cst_137 {dimension_numbers = #tpu.dot_dimension_numbers<[1], [0], [0], [1], [0, 0, 1, 1], [], []>} : vector<8x8xbf16>, vector<8x32xbf16>, vector<8x32xf32> -> vector<8x32xf32>
    %365 = arith.addf %339, %364 : vector<8x32xf32>
    %366 = arith.addf %226, %365 : vector<8x32xf32>
    %c1_138 = arith.constant 1 : index
    %c0_139 = arith.constant 0 : index
    %c0_140 = arith.constant 0 : index
    %367 = vector.load %arg11[%c1_138, %c0_139, %c0_140] : memref<2x1x32xf32, #tpu.memory_space<vmem>>, vector<1x1x32xf32>
    %368 = vector.shape_cast %367 : vector<1x1x32xf32> to vector<1x32xf32>
    %369 = vector.broadcast %368 : vector<1x32xf32> to vector<8x32xf32>
    %370 = arith.addf %366, %369 : vector<8x32xf32>
    %c1_141 = arith.constant 1 : index
    %c0_142 = arith.constant 0 : index
    %c0_143 = arith.constant 0 : index
    %371 = vector.load %arg12[%c1_141, %c0_142, %c0_143] : memref<2x1x32xf32, #tpu.memory_space<vmem>>, vector<1x1x32xf32>
    %372 = vector.shape_cast %371 : vector<1x1x32xf32> to vector<1x32xf32>
    %c1_144 = arith.constant 1 : index
    %c0_145 = arith.constant 0 : index
    %c0_146 = arith.constant 0 : index
    %373 = vector.load %arg13[%c1_144, %c0_145, %c0_146] : memref<2x1x32xf32, #tpu.memory_space<vmem>>, vector<1x1x32xf32>
    %374 = vector.shape_cast %373 : vector<1x1x32xf32> to vector<1x32xf32>
    %cst_147 = arith.constant dense<0.000000e+00> : vector<8xf32>
    %375 = vector.multi_reduction <add>, %370, %cst_147 [1] : vector<8x32xf32> to vector<8xf32>
    %376 = vector.shape_cast %375 : vector<8xf32> to vector<8x1xf32>
    %cst_148 = arith.constant 3.200000e+01 : f32
    %377 = vector.broadcast %cst_148 : f32 to vector<8x1xf32>
    %378 = arith.divf %376, %377 : vector<8x1xf32>
    %379 = vector.broadcast %378 : vector<8x1xf32> to vector<8x32xf32>
    %380 = arith.subf %370, %379 : vector<8x32xf32>
    %381 = arith.mulf %380, %380 : vector<8x32xf32>
    %cst_149 = arith.constant dense<0.000000e+00> : vector<8xf32>
    %382 = vector.multi_reduction <add>, %381, %cst_149 [1] : vector<8x32xf32> to vector<8xf32>
    %383 = vector.shape_cast %382 : vector<8xf32> to vector<8x1xf32>
    %cst_150 = arith.constant 3.200000e+01 : f32
    %384 = vector.broadcast %cst_150 : f32 to vector<8x1xf32>
    %385 = arith.divf %383, %384 : vector<8x1xf32>
    %cst_151 = arith.constant 9.99999974E-6 : f32
    %386 = vector.broadcast %cst_151 : f32 to vector<8x1xf32>
    %387 = arith.addf %385, %386 : vector<8x1xf32>
    %388 = math.rsqrt %387 : vector<8x1xf32>
    %389 = vector.broadcast %388 : vector<8x1xf32> to vector<8x32xf32>
    %390 = arith.mulf %380, %389 : vector<8x32xf32>
    %391 = vector.broadcast %372 : vector<1x32xf32> to vector<8x32xf32>
    %392 = arith.mulf %390, %391 : vector<8x32xf32>
    %393 = vector.broadcast %374 : vector<1x32xf32> to vector<8x32xf32>
    %394 = arith.addf %392, %393 : vector<8x32xf32>
    %395 = arith.truncf %394 : vector<8x32xf32> to vector<8x32xbf16>
    %c1_152 = arith.constant 1 : index
    %c0_153 = arith.constant 0 : index
    %c0_154 = arith.constant 0 : index
    %396 = vector.load %arg14[%c1_152, %c0_153, %c0_154] : memref<2x32x128xbf16, #tpu.memory_space<vmem>>, vector<1x32x128xbf16>
    %397 = vector.shape_cast %396 : vector<1x32x128xbf16> to vector<32x128xbf16>
    %cst_155 = arith.constant dense<0.000000e+00> : vector<8x128xf32>
    %398 = tpu.matmul %395, %397, %cst_155 {dimension_numbers = #tpu.dot_dimension_numbers<[1], [0], [0], [1], [0, 0, 1, 1], [], []>} : vector<8x32xbf16>, vector<32x128xbf16>, vector<8x128xf32> -> vector<8x128xf32>
    %c1_156 = arith.constant 1 : index
    %c0_157 = arith.constant 0 : index
    %c0_158 = arith.constant 0 : index
    %399 = vector.load %arg15[%c1_156, %c0_157, %c0_158] : memref<2x1x128xf32, #tpu.memory_space<vmem>>, vector<1x1x128xf32>
    %400 = vector.shape_cast %399 : vector<1x1x128xf32> to vector<1x128xf32>
    %401 = vector.broadcast %400 : vector<1x128xf32> to vector<8x128xf32>
    %402 = arith.addf %398, %401 : vector<8x128xf32>
    %cst_159 = arith.constant 1.702000e+00 : f32
    %403 = vector.broadcast %cst_159 : f32 to vector<8x128xf32>
    %404 = arith.mulf %403, %402 : vector<8x128xf32>
    %405 = arith.negf %404 : vector<8x128xf32>
    %406 = math.exp %405 : vector<8x128xf32>
    %cst_160 = arith.constant 1.000000e+00 : f32
    %407 = vector.broadcast %cst_160 : f32 to vector<8x128xf32>
    %408 = arith.addf %407, %406 : vector<8x128xf32>
    %409 = arith.divf %407, %408 : vector<8x128xf32>
    %410 = arith.mulf %402, %409 : vector<8x128xf32>
    %411 = arith.truncf %410 : vector<8x128xf32> to vector<8x128xbf16>
    %c1_161 = arith.constant 1 : index
    %c0_162 = arith.constant 0 : index
    %c0_163 = arith.constant 0 : index
    %412 = vector.load %arg16[%c1_161, %c0_162, %c0_163] : memref<2x128x32xbf16, #tpu.memory_space<vmem>>, vector<1x128x32xbf16>
    %413 = vector.shape_cast %412 : vector<1x128x32xbf16> to vector<128x32xbf16>
    %cst_164 = arith.constant dense<0.000000e+00> : vector<8x32xf32>
    %414 = tpu.matmul %411, %413, %cst_164 {dimension_numbers = #tpu.dot_dimension_numbers<[1], [0], [0], [1], [0, 0, 1, 1], [], []>} : vector<8x128xbf16>, vector<128x32xbf16>, vector<8x32xf32> -> vector<8x32xf32>
    %c1_165 = arith.constant 1 : index
    %c0_166 = arith.constant 0 : index
    %c0_167 = arith.constant 0 : index
    %415 = vector.load %arg17[%c1_165, %c0_166, %c0_167] : memref<2x1x32xf32, #tpu.memory_space<vmem>>, vector<1x1x32xf32>
    %416 = vector.shape_cast %415 : vector<1x1x32xf32> to vector<1x32xf32>
    %417 = vector.broadcast %416 : vector<1x32xf32> to vector<8x32xf32>
    %418 = arith.addf %414, %417 : vector<8x32xf32>
    %419 = arith.addf %370, %418 : vector<8x32xf32>
    %420 = vector.extract_strided_slice %419 {offsets = [0, 0], sizes = [1, 32], strides = [1, 1]} : vector<8x32xf32> to vector<1x32xf32>
    %c0_168 = arith.constant 0 : index
    %c0_169 = arith.constant 0 : index
    %421 = vector.load %arg18[%c0_168, %c0_169] : memref<1x32xf32, #tpu.memory_space<vmem>>, vector<1x32xf32>
    %c0_170 = arith.constant 0 : index
    %c0_171 = arith.constant 0 : index
    %422 = vector.load %arg19[%c0_170, %c0_171] : memref<1x32xf32, #tpu.memory_space<vmem>>, vector<1x32xf32>
    %cst_172 = arith.constant dense<0.000000e+00> : vector<1xf32>
    %423 = vector.multi_reduction <add>, %420, %cst_172 [1] : vector<1x32xf32> to vector<1xf32>
    %424 = vector.shape_cast %423 : vector<1xf32> to vector<1x1xf32>
    %cst_173 = arith.constant 3.200000e+01 : f32
    %425 = vector.broadcast %cst_173 : f32 to vector<1x1xf32>
    %426 = arith.divf %424, %425 : vector<1x1xf32>
    %427 = vector.broadcast %426 : vector<1x1xf32> to vector<1x32xf32>
    %428 = arith.subf %420, %427 : vector<1x32xf32>
    %429 = arith.mulf %428, %428 : vector<1x32xf32>
    %cst_174 = arith.constant dense<0.000000e+00> : vector<1xf32>
    %430 = vector.multi_reduction <add>, %429, %cst_174 [1] : vector<1x32xf32> to vector<1xf32>
    %431 = vector.shape_cast %430 : vector<1xf32> to vector<1x1xf32>
    %cst_175 = arith.constant 3.200000e+01 : f32
    %432 = vector.broadcast %cst_175 : f32 to vector<1x1xf32>
    %433 = arith.divf %431, %432 : vector<1x1xf32>
    %cst_176 = arith.constant 9.99999974E-6 : f32
    %434 = vector.broadcast %cst_176 : f32 to vector<1x1xf32>
    %435 = arith.addf %433, %434 : vector<1x1xf32>
    %436 = math.rsqrt %435 : vector<1x1xf32>
    %437 = vector.broadcast %436 : vector<1x1xf32> to vector<1x32xf32>
    %438 = arith.mulf %428, %437 : vector<1x32xf32>
    %439 = arith.mulf %438, %421 : vector<1x32xf32>
    %440 = arith.addf %439, %422 : vector<1x32xf32>
    %441 = arith.truncf %440 : vector<1x32xf32> to vector<1x32xbf16>
    %c0_177 = arith.constant 0 : index
    %c0_178 = arith.constant 0 : index
    %442 = vector.load %arg20[%c0_177, %c0_178] : memref<32x16xbf16, #tpu.memory_space<vmem>>, vector<32x16xbf16>
    %cst_179 = arith.constant dense<0.000000e+00> : vector<1x16xf32>
    %443 = tpu.matmul %441, %442, %cst_179 {dimension_numbers = #tpu.dot_dimension_numbers<[1], [0], [0], [1], [0, 0, 1, 1], [], []>} : vector<1x32xbf16>, vector<32x16xbf16>, vector<1x16xf32> -> vector<1x16xf32>
    %444 = arith.mulf %443, %443 : vector<1x16xf32>
    %cst_180 = arith.constant dense<0.000000e+00> : vector<1xf32>
    %445 = vector.multi_reduction <add>, %444, %cst_180 [1] : vector<1x16xf32> to vector<1xf32>
    %446 = vector.shape_cast %445 : vector<1xf32> to vector<1x1xf32>
    %447 = math.rsqrt %446 : vector<1x1xf32>
    %448 = vector.broadcast %447 : vector<1x1xf32> to vector<1x16xf32>
    %449 = arith.mulf %443, %448 : vector<1x16xf32>
    %c0_181 = arith.constant 0 : index
    %c0_182 = arith.constant 0 : index
    %c0_183 = arith.constant 0 : index
    %450 = vector.load %arg21[%c0_181, %c0_182, %c0_183] : memref<1x8x16xf32, #tpu.memory_space<vmem>>, vector<1x8x16xf32>
    %451 = vector.shape_cast %450 : vector<1x8x16xf32> to vector<8x16xf32>
    "tpu.trace_start"() <{level = 10 : i32, message = "qe,te->qt"}> : () -> ()
    %cst_184 = arith.constant dense<0.000000e+00> : vector<1x8xf32>
    %452 = tpu.matmul %449, %451, %cst_184 {dimension_numbers = #tpu.dot_dimension_numbers<[1], [1], [0], [0], [0, 0, 1, 0], [], []>} : vector<1x16xf32>, vector<8x16xf32>, vector<1x8xf32> -> vector<1x8xf32>
    "tpu.trace_stop"() : () -> ()
    %cst_185 = arith.constant dense<0xFF800000> : vector<1xf32>
    %453 = vector.multi_reduction <maximumf>, %452, %cst_185 [1] : vector<1x8xf32> to vector<1xf32>
    %454 = vector.shape_cast %453 : vector<1xf32> to vector<1x1xf32>
    %455 = vector.broadcast %454 : vector<1x1xf32> to vector<1x8xf32>
    %456 = arith.subf %452, %455 : vector<1x8xf32>
    %457 = math.exp %456 : vector<1x8xf32>
    %cst_186 = arith.constant dense<0.000000e+00> : vector<1xf32>
    %458 = vector.multi_reduction <add>, %457, %cst_186 [1] : vector<1x8xf32> to vector<1xf32>
    %459 = vector.shape_cast %458 : vector<1xf32> to vector<1x1xf32>
    %460 = tpu.reciprocal %459 {approx = true} : vector<1x1xf32> -> vector<1x1xf32>
    %461 = vector.broadcast %460 : vector<1x1xf32> to vector<1x8xf32>
    %462 = arith.mulf %457, %461 : vector<1x8xf32>
    %463 = vector.shape_cast %462 : vector<1x8xf32> to vector<1x1x8xf32>
    %c0_187 = arith.constant 0 : index
    %c0_188 = arith.constant 0 : index
    %c0_189 = arith.constant 0 : index
    %464 = vector.load %arg22[%c0_187, %c0_188, %c0_189] : memref<1x1x8xf32, #tpu.memory_space<vmem>>, vector<1x1x8xf32>
    tpu.vector_store %arg22[%c0_187, %c0_188, %c0_189], %463 {strides = array<i32>} : memref<1x1x8xf32, #tpu.memory_space<vmem>>, vector<1x1x8xf32>,
    return
  }
  func.func @transform_0(%arg0: i32) -> (i32, i32, i32) {
    %c0_i32 = arith.constant 0 : i32
    %c0_i32_0 = arith.constant 0 : i32
    %c0_i32_1 = arith.constant 0 : i32
    return %arg0, %c0_i32, %c0_i32_0 : i32, i32, i32
  }
  func.func @transform_1(%arg0: i32) -> (i32, i32) {
    %c0_i32 = arith.constant 0 : i32
    %c0_i32_0 = arith.constant 0 : i32
    %c0_i32_1 = arith.constant 0 : i32
    return %c0_i32, %c0_i32_0 : i32, i32
  }
  func.func @transform_2(%arg0: i32) -> (i32, i32) {
    %c0_i32 = arith.constant 0 : i32
    %c0_i32_0 = arith.constant 0 : i32
    %c0_i32_1 = arith.constant 0 : i32
    return %c0_i32, %c0_i32_0 : i32, i32
  }
  func.func @transform_3(%arg0: i32) -> (i32, i32) {
    %c0_i32 = arith.constant 0 : i32
    %c0_i32_0 = arith.constant 0 : i32
    %c0_i32_1 = arith.constant 0 : i32
    return %c0_i32, %c0_i32_0 : i32, i32
  }
  func.func @transform_4(%arg0: i32) -> (i32, i32) {
    %c0_i32 = arith.constant 0 : i32
    %c0_i32_0 = arith.constant 0 : i32
    %c0_i32_1 = arith.constant 0 : i32
    return %c0_i32, %c0_i32_0 : i32, i32
  }
  func.func @transform_5(%arg0: i32) -> (i32, i32, i32) {
    %c0_i32 = arith.constant 0 : i32
    %c0_i32_0 = arith.constant 0 : i32
    %c0_i32_1 = arith.constant 0 : i32
    %c0_i32_2 = arith.constant 0 : i32
    return %c0_i32, %c0_i32_0, %c0_i32_1 : i32, i32, i32
  }
  func.func @transform_6(%arg0: i32) -> (i32, i32, i32) {
    %c0_i32 = arith.constant 0 : i32
    %c0_i32_0 = arith.constant 0 : i32
    %c0_i32_1 = arith.constant 0 : i32
    %c0_i32_2 = arith.constant 0 : i32
    return %c0_i32, %c0_i32_0, %c0_i32_1 : i32, i32, i32
  }
  func.func @transform_7(%arg0: i32) -> (i32, i32, i32) {
    %c0_i32 = arith.constant 0 : i32
    %c0_i32_0 = arith.constant 0 : i32
    %c0_i32_1 = arith.constant 0 : i32
    %c0_i32_2 = arith.constant 0 : i32
    return %c0_i32, %c0_i32_0, %c0_i32_1 : i32, i32, i32
  }
  func.func @transform_8(%arg0: i32) -> (i32, i32, i32) {
    %c0_i32 = arith.constant 0 : i32
    %c0_i32_0 = arith.constant 0 : i32
    %c0_i32_1 = arith.constant 0 : i32
    %c0_i32_2 = arith.constant 0 : i32
    return %c0_i32, %c0_i32_0, %c0_i32_1 : i32, i32, i32
  }
  func.func @transform_9(%arg0: i32) -> (i32, i32, i32) {
    %c0_i32 = arith.constant 0 : i32
    %c0_i32_0 = arith.constant 0 : i32
    %c0_i32_1 = arith.constant 0 : i32
    %c0_i32_2 = arith.constant 0 : i32
    return %c0_i32, %c0_i32_0, %c0_i32_1 : i32, i32, i32
  }
  func.func @transform_10(%arg0: i32) -> (i32, i32, i32) {
    %c0_i32 = arith.constant 0 : i32
    %c0_i32_0 = arith.constant 0 : i32
    %c0_i32_1 = arith.constant 0 : i32
    %c0_i32_2 = arith.constant 0 : i32
    return %c0_i32, %c0_i32_0, %c0_i32_1 : i32, i32, i32
  }
  func.func @transform_11(%arg0: i32) -> (i32, i32, i32) {
    %c0_i32 = arith.constant 0 : i32
    %c0_i32_0 = arith.constant 0 : i32
    %c0_i32_1 = arith.constant 0 : i32
    %c0_i32_2 = arith.constant 0 : i32
    return %c0_i32, %c0_i32_0, %c0_i32_1 : i32, i32, i32
  }
  func.func @transform_12(%arg0: i32) -> (i32, i32, i32) {
    %c0_i32 = arith.constant 0 : i32
    %c0_i32_0 = arith.constant 0 : i32
    %c0_i32_1 = arith.constant 0 : i32
    %c0_i32_2 = arith.constant 0 : i32
    return %c0_i32, %c0_i32_0, %c0_i32_1 : i32, i32, i32
  }
  func.func @transform_13(%arg0: i32) -> (i32, i32, i32) {
    %c0_i32 = arith.constant 0 : i32
    %c0_i32_0 = arith.constant 0 : i32
    %c0_i32_1 = arith.constant 0 : i32
    %c0_i32_2 = arith.constant 0 : i32
    return %c0_i32, %c0_i32_0, %c0_i32_1 : i32, i32, i32
  }
  func.func @transform_14(%arg0: i32) -> (i32, i32, i32) {
    %c0_i32 = arith.constant 0 : i32
    %c0_i32_0 = arith.constant 0 : i32
    %c0_i32_1 = arith.constant 0 : i32
    %c0_i32_2 = arith.constant 0 : i32
    return %c0_i32, %c0_i32_0, %c0_i32_1 : i32, i32, i32
  }
  func.func @transform_15(%arg0: i32) -> (i32, i32, i32) {
    %c0_i32 = arith.constant 0 : i32
    %c0_i32_0 = arith.constant 0 : i32
    %c0_i32_1 = arith.constant 0 : i32
    %c0_i32_2 = arith.constant 0 : i32
    return %c0_i32, %c0_i32_0, %c0_i32_1 : i32, i32, i32
  }
  func.func @transform_16(%arg0: i32) -> (i32, i32, i32) {
    %c0_i32 = arith.constant 0 : i32
    %c0_i32_0 = arith.constant 0 : i32
    %c0_i32_1 = arith.constant 0 : i32
    %c0_i32_2 = arith.constant 0 : i32
    return %c0_i32, %c0_i32_0, %c0_i32_1 : i32, i32, i32
  }
  func.func @transform_17(%arg0: i32) -> (i32, i32) {
    %c0_i32 = arith.constant 0 : i32
    %c0_i32_0 = arith.constant 0 : i32
    %c0_i32_1 = arith.constant 0 : i32
    return %c0_i32, %c0_i32_0 : i32, i32
  }
  func.func @transform_18(%arg0: i32) -> (i32, i32) {
    %c0_i32 = arith.constant 0 : i32
    %c0_i32_0 = arith.constant 0 : i32
    %c0_i32_1 = arith.constant 0 : i32
    return %c0_i32, %c0_i32_0 : i32, i32
  }
  func.func @transform_19(%arg0: i32) -> (i32, i32) {
    %c0_i32 = arith.constant 0 : i32
    %c0_i32_0 = arith.constant 0 : i32
    %c0_i32_1 = arith.constant 0 : i32
    return %c0_i32, %c0_i32_0 : i32, i32
  }
  func.func @transform_20(%arg0: i32) -> (i32, i32, i32) {
    %c0_i32 = arith.constant 0 : i32
    %c0_i32_0 = arith.constant 0 : i32
    %c0_i32_1 = arith.constant 0 : i32
    return %arg0, %c0_i32, %c0_i32_0 : i32, i32, i32
  }
  func.func @transform_21(%arg0: i32) -> (i32, i32, i32) {
    %c0_i32 = arith.constant 0 : i32
    %c0_i32_0 = arith.constant 0 : i32
    %c0_i32_1 = arith.constant 0 : i32
    return %arg0, %c0_i32, %c0_i32_0 : i32, i32, i32
  }
}

</mosaic_0001>

<bundles_post_ra>
// kernel: clip_model_forward.1
= control target key start
LH: loop header
LB: loop body
LE: loop exit
PB: predicated region body
PF: predicated region fallthrough
CT: control target
= control target key end

     0   :  { %s4440_s0 = inlined_call_operand.vmem [shape: bf16[2,8,192], index: 0, kind: input, shape index: {}]   ;;  %s4441_s1 = inlined_call_operand.vmem [shape: bf16[192,32], index: 1, kind: input, shape index: {}]   ;;  %s4442_s2 = inlined_call_operand.vmem [shape: f32[8,32], index: 2, kind: input, shape index: {}]   ;;  %s4443_s3 = inlined_call_operand.vmem [shape: f32[1,32], index: 3, kind: input, shape index: {}]   ;;  %s4444_s4 = inlined_call_operand.vmem [shape: f32[1,32], index: 4, kind: input, shape index: {}]   ;;  %s4445_s5 = inlined_call_operand.vmem [shape: f32[2,1,32], index: 5, kind: input, shape index: {}]   ;;  %s4446_s6 = inlined_call_operand.vmem [shape: f32[2,1,32], index: 6, kind: input, shape index: {}]   ;;  %s4447_s7 = inlined_call_operand.vmem [shape: bf16[2,32,96], index: 7, kind: input, shape index: {}]   ;;  %s4448_s8 = inlined_call_operand.vmem [shape: f32[2,1,96], index: 8, kind: input, shape index: {}]   ;;  %s4449_s9 = inlined_call_operand.vmem [shape: bf16[2,32,32], index: 9, kind: input, shape index: {}]   ;;  %s4450_s10 = inlined_call_operand.vmem [shape: f32[2,1,32], index: 10, kind: input, shape index: {}]   ;;  %s4451_s11 = inlined_call_operand.vmem [shape: f32[2,1,32], index: 11, kind: input, shape index: {}]   ;;  %s4452_s12 = inlined_call_operand.vmem [shape: f32[2,1,32], index: 12, kind: input, shape index: {}]   ;;  %s4453_s13 = inlined_call_operand.vmem [shape: bf16[2,32,128], index: 13, kind: input, shape index: {}]   ;;  %s4454_s14 = inlined_call_operand.vmem [shape: f32[2,1,128], index: 14, kind: input, shape index: {}]   ;;  %s4455_s15 = inlined_call_operand.vmem [shape: bf16[2,128,32], index: 15, kind: input, shape index: {}]   ;;  %s4456_s16 = inlined_call_operand.vmem [shape: f32[2,1,32], index: 16, kind: input, shape index: {}]   ;;  %s4457_s17 = inlined_call_operand.vmem [shape: f32[1,32], index: 17, kind: input, shape index: {}]   ;;  %s4458_s18 = inlined_call_operand.vmem [shape: f32[1,32], index: 18, kind: input, shape index: {}]   ;;  %s4459_s19 = inlined_call_operand.vmem [shape: bf16[32,16], index: 19, kind: input, shape index: {}]   ;;  %s4460_s20 = inlined_call_operand.vmem [shape: f32[2,8,16], index: 20, kind: input, shape index: {}]   ;;  %s4461_s21 = inlined_call_operand.hbm [shape: f32[2,1,8], index: 21, kind: output, shape index: {}]  }
   0x1   :  { %4481 = sst [smem:[#allocation11_spill]] %s4440_s0 }
   0x2   :  { %4482 = sst [smem:[#allocation12_spill]] %s4441_s1 }
   0x3   :  { %4483 = sst [smem:[#allocation13_spill]] %s4442_s2 }
   0x4   :  { %4484 = sst [smem:[#allocation14_spill]] %s4443_s3 }
   0x5   :  { %4485 = sst [smem:[#allocation15_spill]] %s4444_s4 }
   0x6   :  { %4486 = sst [smem:[#allocation16_spill]] %s4445_s5 }
   0x7   :  { %4487 = sst [smem:[#allocation17_spill]] %s4461_s21 }
   0x8   :  { %26 = vsyncpa [#allocation3], 0 }
   0x9   :  { %28 = vsyncpa [#allocation3 + $0x1], 0  ;;  %s3846_s2 = smov 0   ;;  %s3848_s25 = smov 0  }
   0xa   :  { %s3850_s26 = smov 0   ;;  %s3852_s27 = smov 0  }
   0xb LB: > { %4488 = sst [smem:[#allocation5_spill]] %s3706_s2  ;;  %s3867_s3 = sadd.s32 4294967295, %s3718_s27   ;;  %s3718_s27 = sphi %s3852_s27, %s4515_s27   ;;  %s3714_s26 = sphi %s3850_s26, %s4517_s26   ;;  %s3710_s25 = sphi %s3848_s25, %s4519_s25   ;;  %s3706_s2 = sphi %s3846_s2, %s4518_s2  }
   0xc   : > { %4489 = sst [smem:[#allocation6_spill]] %s3714_s26  ;;  %s3053_s28 = sadd.s32 4294967294, %s3718_s27  }
   0xd   : > { %4490 = sst [smem:[#allocation7_spill]] %s3718_s27  ;;  %s3871_s29 = sadd.s32 1, %s3718_s27  }
   0xe   : > { %4491 = sst [smem:[#allocation8_spill]] %s3871_s29  ;;  %s492_s0 = sadd.s32 1, %s3714_s26 }
   0xf   : > { %s489_s4 = ssub.s32 %s3718_s27, %s3871_s29  ;;  %p502_p0 = scmp.ne.s32.totalorder %s3714_s26, %s3710_s25 }
  0x10   : > { %p490_p1 = scmp.eq.s32.totalorder %s489_s4, 0  ;;  %p503_p2 = scmp.eq.s32.totalorder %s3867_s3, 1 }
  0x11   : > { %p508_p3 = scmp.ne.s32.totalorder %s3710_s25, %s3706_s2  ;;  %p509_p4 = scmp.eq.s32.totalorder %s3053_s28, 1 }
  0x12   : > { %s3882_s30 = scalar_select %p490_p1, %s3714_s26, %s492_s0  }
  0x13   : > { %p3884_p5 = por %p503_p2, %p502_p0  ;;  %p3888_p6 = por %p509_p4, %p508_p3 }
  0x14   : > { %4492 = sst [smem:[#allocation9_spill]] %s3882_s30  ;;  %p3056_p7 = scmp.ge.s32.totalorder %s3718_s27, 1 }
  0x15   : > { %s4494_s22 = scalar_select %p3888_p6, 1, 0 }
  0x16   : > { %p599_p8 = scmp.lt.s32.totalorder %s3718_s27, 3 }
  0x17   : > { %4495 = sst [smem:[#allocation10_spill]] %s4494_s22 }
  0x18   : > { %p600_p9 = pnand %p3056_p7, %p599_p8 }
  0x19   : > { %s4496_s24 = sld [smem:[#allocation12_spill]] (!%p600_p9)  ;;  %v3720_v1 = vmov (!%p600_p9), 0   ;;  %p662_p10 = scmp.lt.s32.totalorder (!%p600_p9), %s3867_s3, 1  ;;  %vm776_vm0 = vcmask (!%p600_p9), 523264   ;;  %vm822_vm1 = vcmask (!%p600_p9), 261120   ;;  %v3572_v43 = vld [vmem:[%s4447_s7] sm:$0xff] (!%p600_p9)  }
  0x1a   : > { %603 = sbr.rel (%p600_p9) target bundleno = 10298 (0x283a), region = 104  ;;  %780 = vmatprep.subr.bf16.mxu0 (!%p600_p9), %v3720_v1  ;;  %s4497_s22 = sld [smem:[#allocation11_spill]] (!%p600_p9)  ;;  %v3721_v44 = vmov (!%p600_p9), 0.0   ;;  %vm3722_vm2 = vmmov (!%p600_p9), 0   ;;  %v3573_v45 = vld [vmem:[%s4447_s7 + $0x8] sm:$0xff] (!%p600_p9)   ;;  %vm959_vm3 = vcmask (!%p600_p9), 64512  }
  0x1b   : > { %s4499_s0 = sld [smem:[#allocation14_spill]] (!%p600_p9)  ;;  %s4500_s29 = sld [smem:[#allocation15_spill]] (!%p600_p9)  ;;  %3275 = vmatprep.subr.bf16.mxu1 (!%p600_p9), %v3721_v44  ;;  %3279 = vmatprep.mubr.msk.bf16.mxu1 (!%p600_p9), %vm3722_vm2, %v3721_v44  ;;  %v3078_v52 = vld [vmem:[%s4446_s6] ss:$0 sm:$0xff] (!%p600_p9)  ;;  %vm1025_vm5 = vcmask (!%p600_p9), 1043456   ;;  %vm2799_vm6 = vcmask (!%p600_p9), 253952  }
  0x1c   : > { %3276 = vmatpush3.bf16.msra.mxu1 (!%p600_p9), %v3572_v43  ;;  %v3079_v56 = vld [vmem:[%s4448_s8] ss:$0 sm:$0xff] (!%p600_p9)  ;;  %s3723_s21 = smov (!%p600_p9), 96   ;;  %s3724_s27 = smov (!%p600_p9), 88   ;;  %vm2876_vm7 = vcmask (!%p600_p9), 122880   ;;  %vm2883_vm8 = vcmask (!%p600_p9), 130048  }
  0x1d   : > { %3277 = vmatprep.subr.bf16.mxu1 (!%p600_p9), %v3721_v44  ;;  %s4479_s1 = smov (!%p600_p9), 120   ;;  %s4478_s28 = smov (!%p600_p9), 56   ;;  %vm2960_vm9 = vcmask (!%p600_p9), 57344  }
  0x1e   : > { %s4472_s26 = smov (!%p600_p9), 112   ;;  %s4477_s30 = smov (!%p600_p9), 80  }
  0x1f   : > { %v3558_v0 = vld [vmem:[%s4496_s24] sm:$0xff] (!%p600_p9)   ;;  %v3559_v2 = vld [vmem:[%s4496_s24 + $0x8] sm:$0xff] (!%p600_p9)   ;;  %v3560_v3 = vld [vmem:[%s4496_s24 + $0x10] sm:$0xff] (!%p600_p9)  }
  0x20   : > { %781 = vmatpush1.bf16.msra.mxu0 (!%p600_p9), %v3558_v0  ;;  %v3561_v4 = vld [vmem:[%s4496_s24 + $0x18] sm:$0xff] (!%p600_p9)   ;;  %v3562_v5 = vld [vmem:[%s4496_s24 + $0x20] sm:$0xff] (!%p600_p9)   ;;  %v3563_v8 = vld [vmem:[%s4496_s24 + $0x28] sm:$0xff] (!%p600_p9)   ;;  %3278 = vmatpush3.bf16.msra.mxu1 (!%p600_p9), %v3573_v45 }
  0x21   : > { %782 = vmatprep.subr.bf16.mxu0 %v3720_v1  ;;  %s3902_s4 = scalar_select %p662_p10, %s3867_s3, 1  ;;  %v3564_v9 = vld [vmem:[%s4496_s24 + $0x30] sm:$0xff]   ;;  %v3565_v10 = vld [vmem:[%s4496_s24 + $0x38] sm:$0xff]   ;;  %v3566_v11 = vld [vmem:[%s4496_s24 + $0x40] sm:$0xff]   ;;  %3283 = vmatprep.subr.bf16.mxu1 %v3721_v44 }
  0x22   : > { %v3567_v12 = vld [vmem:[%s4496_s24 + $0x48] sm:$0xff]   ;;  %v3568_v13 = vld [vmem:[%s4496_s24 + $0x50] sm:$0xff]   ;;  %v3569_v14 = vld [vmem:[%s4496_s24 + $0x58] sm:$0xff]  }
  0x23   : > { %s4471_s23 = sshll.u32 %s3902_s4, 3  ;;  %v3075_v32 = vld [vmem:[%s4499_s0] ss:$0 sm:$0xff]  ;;  %s4501_s0 = sld [smem:[#allocation16_spill]] }
  0x24   : > { %783 = vmatpush1.bf16.msra.mxu0 %v3559_v2  ;;  %s666_s2 = scalar_lea.vmem %s4497_s22, %s4471_s23  ;;  %v3076_v34 = vld [vmem:[%s4500_s29] ss:$0 sm:$0xff]  ;;  %s4474_s23 = smov 72  }
  0x25   : > { %784 = vmatprep.subr.bf16.mxu0 %v3720_v1  ;;  %v672_v6 = vld [vmem:[%s666_s2] sm:$0xff]  ;;  %s4498_s2 = sld [smem:[#allocation13_spill]]  ;;  %s4476_s29 = smov 48  }
  0x26   : > { %v3061_v7 = vcombine.high %v672_v6, %v672_v6  ;;  %v3060_v15 = vcombine.low %v672_v6, %v672_v6 }
  0x28   : > { %785 = vmatpush1.bf16.msra.mxu0 %v3560_v3  ;;  %3074 = vmatprep.mubr.msk.bf16.mxu0 %vm776_vm0, %v3061_v7 }
  0x29   : > { %786 = vmatprep.subr.bf16.mxu0 %v3720_v1  ;;  %v3077_v50 = vld [vmem:[%s4501_s0] ss:$0 sm:$0xff] }
  0x2b   : > { %v697_v16 = vld [vmem:[%s4498_s2] sm:$0xff]  ;;  %s3726_s2 = smov 64  }
  0x2c   : > { %787 = vmatpush1.bf16.msra.mxu0 %v3561_v4  ;;  %v3725_v4 = vmov -1e+30  }
  0x2d   : > { %788 = vmatprep.subr.bf16.mxu0 %v3720_v1 }
  0x30   : > { %789 = vmatpush1.bf16.msra.mxu0 %v3562_v5 }
  0x31   : > { %790 = vmatprep.subr.bf16.mxu0 %v3720_v1 }
  0x34   : > { %791 = vmatpush1.bf16.msra.mxu0 %v3563_v8 }
  0x35   : > { %792 = vmatprep.subr.bf16.mxu0 %v3720_v1 }
  0x38   : > { %793 = vmatpush1.bf16.msra.mxu0 %v3564_v9 }
  0x39   : > { %794 = vmatprep.subr.bf16.mxu0 %v3720_v1 }
  0x3c   : > { %795 = vmatpush1.bf16.msra.mxu0 %v3565_v10 }
  0x3d   : > { %796 = vmatprep.subr.bf16.mxu0 %v3720_v1 }
  0x40   : > { %797 = vmatpush1.bf16.msra.mxu0 %v3566_v11 }
  0x41   : > { %798 = vmatprep.subr.bf16.mxu0 %v3720_v1 }
  0x44   : > { %799 = vmatpush1.bf16.msra.mxu0 %v3567_v12 }
  0x45   : > { %800 = vmatprep.subr.bf16.mxu0 %v3720_v1 }
  0x48   : > { %801 = vmatpush1.bf16.msra.mxu0 %v3568_v13 }
  0x49   : > { %802 = vmatprep.subr.bf16.mxu0 %v3720_v1  ;;  %v851_v1 = vlaneseq }
  0x4b   : > { %v852_v2 = vand.u32 127, %v851_v1 }
  0x4c   : > { %803 = vmatpush1.bf16.msra.mxu0 %v3569_v14 }
  0x4d   : > { %3325 = vmatprep.subr.bf16.mxu0 %v3721_v44  ;;  %vm853_vm4 = vcmp.lt.s32.totalorder %v852_v2, 5 }
  0x4e   : > { %v3995_v5 = vsel %vm853_vm4, 0.0, %v3725_v4 }
  0x4f   : > { %813 = vmatmul.mubr.bf16.vlgmr.msra.gmra.mrb[0].mxu0 %v3060_v15 }
  0x50   : > { %3327 = vmatprep.mubr.msk.bf16.mxu0 %vm3722_vm2, %v3721_v44 }
 0x122   : > { %v814_v17 = vpop.f32.mrb[0].mxu0 }
 0x123   : > { %v815_v18 = vadd.f32 %v814_v17, %v697_v16  ;;  %v816_v19 = vpop.f32.mrb[1].mxu0 }
 0x124   : > { %v817_v20 = vpop.f32.mrb[2].mxu0 }
 0x125   : > { %v818_v21 = vpop.f32.mrb[3].mxu0  ;;  %v823_v22 = vsel %vm822_vm1, %v815_v18, 0.0 }
 0x126   : > { %824 = vadd.xlane.f32.xlu0 %v823_v22 }
 0x1b3   : > { %v825_v23 = vpop.xlane.xlu0 %824 }
 0x1b4   : > { %v827_v24 = vmul.f32 0.03125, %v825_v23 }
 0x1b6   : > { %v828_v25 = vsub.f32 %v815_v18, %v827_v24 }
 0x1b8   : > { %v829_v26 = vmul.f32 %v828_v25, %v828_v25 }
 0x1ba   : > { %v830_v27 = vsel %vm822_vm1, %v829_v26, 0.0 }
 0x1bb   : > { %831 = vadd.xlane.f32.xlu0 %v830_v27 }
 0x248   : > { %v832_v28 = vpop.xlane.xlu0 %831 }
 0x249   : > { %v833_v29 = vmul.f32 0.03125, %v832_v28 }
 0x24b   : > { %v834_v30 = vadd.f32 1e-05, %v833_v29 }
 0x24d   : > { %3598 = vrsqrt.f32 %v834_v30 }
 0x257   : > { %v3599_v31 = vpop.eup %3598 }
 0x258   : > { %v836_v33 = vmul.f32 %v3599_v31, %v828_v25 }
 0x25a   : > { %v843_v35 = vmul.f32 %v3075_v32, %v836_v33 }
 0x25c   : > { %v3951_v36 = vadd.f32 %v3076_v34, %v843_v35 }
 0x25e   : > { %v857_v37 = vsel %vm822_vm1, %v3951_v36, 0.0 }
 0x25f   : > { %858 = vadd.xlane.f32.xlu1 %v857_v37 }
 0x2ec   : > { %v859_v38 = vpop.xlane.xlu1 %858 }
 0x2ed   : > { %v860_v39 = vmul.f32 0.03125, %v859_v38 }
 0x2ef   : > { %v861_v40 = vsub.f32 %v3951_v36, %v860_v39 }
 0x2f1   : > { %v862_v41 = vmul.f32 %v861_v40, %v861_v40 }
 0x2f3   : > { %v863_v42 = vsel %vm822_vm1, %v862_v41, 0.0 }
 0x2f4   : > { %864 = vadd.xlane.f32.xlu1 %v863_v42 }
 0x381   : > { %v865_v46 = vpop.xlane.xlu1 %864 }
 0x382   : > { %v866_v47 = vmul.f32 0.03125, %v865_v46 }
 0x384   : > { %v867_v48 = vadd.f32 1e-05, %v866_v47 }
 0x386   : > { %3600 = vrsqrt.f32 %v867_v48  ;;  %v952_v48 = vld [vmem:[%s4449_s9 + $0x4] sm:$0xf] }
 0x390   : > { %v3601_v49 = vpop.eup %3600 }
 0x391   : > { %v869_v51 = vmul.f32 %v3601_v49, %v861_v40 }
 0x393   : > { %v876_v53 = vmul.f32 %v3077_v50, %v869_v51  ;;  %v1187_v51 = vsel %vm1025_vm5, %v952_v48, 0 }
 0x395   : > { %v883_v54 = vadd.f32 %v3078_v52, %v876_v53  ;;  %v951_v52 = vld [vmem:[%s4449_s9] sm:$0xf] }
 0x397   : > { %v884_v55 = vpack.c.bf16 %v883_v54, %v883_v54 }
 0x399   : > { %3280 = vmatmul.mubr.msk.bf16.vlgmr.msra.gmra.mrb[0].mxu1 %vm822_vm1, %v884_v55 }
 0x39a   : > { %3285 = vmatprep.mubr.msk.bf16.mxu1 %vm3722_vm2, %v3721_v44 }
 0x46c   : > { %v945_v57 = vpop.f32.mrb[0].mxu1 }
 0x46d   : > { %v946_v58 = vadd.f32 %v3079_v56, %v945_v57  ;;  %v3281_v59 = vpop.f32.mrb[1].mxu1  ;;  %v1233_v56 = vsel %vm1025_vm5, %v951_v52, 0 }
 0x46e   : > { %v948_v60 = vpop.f32.mrb[2].mxu1 }
 0x46f   : > { %v3983_v61 = vpack.c.bf16 %v946_v58, %v946_v58  ;;  %v3282_v62 = vpop.f32.mrb[3].mxu1 }
 0x471   : > { %957 = vrot.lane.b32.xlu0 %v3983_v61, %s3723_s21 }
 0x475   : > { %1072 = vrot.lane.b32.xlu0 %v3983_v61, %s3724_s27 }
 0x4e3   : > { %v958_v63 = vpop.permute.xlu0 %957 }
 0x4e4   : > { %v964_v0 = vsel %vm959_vm3, %v958_v63, 0 }
 0x4e5   : > { %3284 = vmatpush3.bf16.xpose.msra.mxu1 %v964_v0 }
 0x4e6   : > { %3289 = vmatprep.subr.bf16.mxu1 %v3721_v44 }
 0x4e7   : > { %v1073_v22 = vpop.permute.xlu0 %1072 }
 0x4e8   : > { %v1078_v24 = vsel %vm959_vm3, %v1073_v22, 0 }
 0x4ec   : > { %3286 = vmatmul.mubr.msk.bf16.vlgmr.msra.gmra.mrb[4].mxu1 %vm959_vm3, %v3983_v61 }
 0x4ed   : > { %3291 = vmatprep.mubr.msk.bf16.mxu1 %vm3722_vm2, %v3721_v44 }
 0x5bf   : > { %v1000_v3 = vpop.f32.mrb[4].mxu1 }
 0x5c0   : > { %v1006_v6 = vmul.f32 0.35355338, %v1000_v3  ;;  %v3287_v7 = vpop.f32.mrb[5].mxu1 }
 0x5c1   : > { %v1003_v8 = vpop.f32.mrb[6].mxu1 }
 0x5c2   : > { %v3288_v9 = vpop.f32.mrb[7].mxu1  ;;  %v1007_v10 = vadd.f32 %v1006_v6, %v3995_v5 }
 0x5c4   : > { %v1008_v11 = vsel %vm959_vm3, %v1007_v10, -inf }
 0x5c5   : > { %1009 = vmax.xlane.f32.xlu1 %v1008_v11 }
 0x652   : > { %v1010_v12 = vpop.xlane.xlu1 %1009 }
 0x653   : > { %v1011_v13 = vsub.f32 %v1007_v10, %v1010_v12 }
 0x655   : > { %v1012_v14 = vmul.f32 1.442695, %v1011_v13 }
 0x657   : > { %3602 = vpow2.f32 %v1012_v14 }
 0x661   : > { %v3603_v15 = vpop.eup %3602 }
 0x662   : > { %v1014_v16 = vsel %vm959_vm3, %v3603_v15, 0.0 }
 0x663   : > { %1015 = vadd.xlane.f32.xlu1 %v1014_v16 }
 0x674   : > { %1020 = vrot.lane.b32.xlu1 %v3983_v61, %s3726_s2 }
 0x678   : > { %1070 = vrot.lane.b32.xlu1 %v3983_v61, %s4479_s1 }
 0x6f0   : > { %v1016_v17 = vpop.xlane.xlu1 %1015 }
 0x6f1   : > { %3604 = vrcp.f32 %v1016_v17 }
 0x6f4   : > { %v1021_v18 = vpop.permute.xlu1 %1020 }
 0x6f5   : > { %v1027_v19 = vsel %vm1025_vm5, %v1021_v18, 0 }
 0x6f6   : > { %3290 = vmatpush3.bf16.msra.mxu1 %v1027_v19 }
 0x6f7   : > { %3295 = vmatprep.subr.bf16.mxu1 %v3721_v44 }
 0x6f8   : > { %v1071_v25 = vpop.permute.xlu1 %1070 }
 0x6fb   : > { %v3605_v20 = vpop.eup %3604 }
 0x6fc   : > { %v1018_v21 = vmul.f32 %v3605_v20, %v3603_v15 }
 0x6fe   : > { %v1019_v23 = vpack.c.bf16 %v1018_v21, %v1018_v21 }
 0x700   : > { %3292 = vmatmul.mubr.msk.bf16.vlgmr.msra.gmra.mrb[8].mxu1 %vm959_vm3, %v1019_v23 }
 0x701   : > { %3296 = vmatpush3.bf16.xpose.msra.mxu1 %v1078_v24  ;;  %3297 = vmatprep.mubr.msk.bf16.mxu1 %vm3722_vm2, %v3721_v44 }
 0x702   : > { %3301 = vmatprep.subr.bf16.mxu1 %v3721_v44 }
 0x708   : > { %3298 = vmatmul.mubr.msk.bf16.vlgmr.msra.gmra.mrb[12].mxu1 %vm959_vm3, %v1071_v25 }
 0x709   : > { %3303 = vmatprep.mubr.msk.bf16.mxu1 %vm3722_vm2, %v3721_v44 }
 0x7d3   : > { %v1063_v26 = vpop.f32.mrb[8].mxu1 }
 0x7d4   : > { %v3293_v27 = vpop.f32.mrb[9].mxu1  ;;  %v1069_v59 = vpack.c.bf16 %v1063_v26, %v1063_v26 }
 0x7d5   : > { %v1066_v28 = vpop.f32.mrb[10].mxu1 }
 0x7d6   : > { %v3294_v29 = vpop.f32.mrb[11].mxu1 }
 0x7db   : > { %v1114_v30 = vpop.f32.mrb[12].mxu1 }
 0x7dc   : > { %v1120_v31 = vmul.f32 0.35355338, %v1114_v30  ;;  %v3299_v32 = vpop.f32.mrb[13].mxu1 }
 0x7dd   : > { %v1117_v33 = vpop.f32.mrb[14].mxu1 }
 0x7de   : > { %v3300_v34 = vpop.f32.mrb[15].mxu1  ;;  %v1121_v35 = vadd.f32 %v1120_v31, %v3995_v5  ;;  %v953_v31 = vld [vmem:[%s4449_s9 + $0x8] sm:$0xf] }
 0x7df   : > { %v1392_v32 = vsel %vm1025_vm5, %v953_v31, 0 }
 0x7e0   : > { %v1122_v37 = vsel %vm959_vm3, %v1121_v35, -inf }
 0x7e1   : > { %1123 = vmax.xlane.f32.xlu0 %v1122_v37 }
 0x7f7   : > { %1134 = vrot.lane.b32.xlu0 %v3983_v61, %s4478_s28  ;;  %s4505_s28 = smov 112  }
 0x7fb   : > { %1275 = vrot.lane.b32.xlu0 %v3983_v61, %s4472_s26  ;;  %s4473_s26 = smov 104  }
 0x86e   : > { %v1124_v38 = vpop.xlane.xlu0 %1123 }
 0x86f   : > { %v1125_v39 = vsub.f32 %v1121_v35, %v1124_v38 }
 0x871   : > { %v1126_v40 = vmul.f32 1.442695, %v1125_v39 }
 0x872   : > { %v1135_v41 = vpop.permute.xlu0 %1134 }
 0x873   : > { %3606 = vpow2.f32 %v1126_v40  ;;  %v1140_v42 = vsel %vm1025_vm5, %v1135_v41, 0 }
 0x874   : > { %3302 = vmatpush3.bf16.msra.mxu1 %v1140_v42 }
 0x875   : > { %3307 = vmatprep.subr.bf16.mxu1 %v3721_v44 }
 0x876   : > { %v1276_v63 = vpop.permute.xlu0 %1275 }
 0x87d   : > { %v3607_v43 = vpop.eup %3606 }
 0x87e   : > { %v1128_v45 = vsel %vm959_vm3, %v3607_v43, 0.0 }
 0x87f   : > { %1129 = vadd.xlane.f32.xlu1 %v1128_v45 }
 0x890   : > { %1277 = vrot.lane.b32.xlu1 %v3983_v61, %s4477_s30  ;;  %s4510_s30 = sshll.u32 %s3902_s4, 3  ;;  %s660_s4 = sand.u32 1, %s3710_s25  }
 0x891   : > { %s670_s1 = scalar_lea.vmem %s4460_s20, %s4510_s30 }
 0x90c   : > { %v1130_v46 = vpop.xlane.xlu1 %1129 }
 0x90d   : > { %3608 = vrcp.f32 %v1130_v46 }
 0x910   : > { %v1278_v60 = vpop.permute.xlu1 %1277 }
 0x911   : > { %v1283_v62 = vsel %vm959_vm3, %v1278_v60, 0 }
 0x917   : > { %v3609_v47 = vpop.eup %3608 }
 0x918   : > { %v1132_v49 = vmul.f32 %v3609_v47, %v3607_v43 }
 0x91a   : > { %v1133_v50 = vpack.c.bf16 %v1132_v49, %v1132_v49 }
 0x91c   : > { %3304 = vmatmul.mubr.msk.bf16.vlgmr.msra.gmra.mrb[16].mxu1 %vm959_vm3, %v1133_v50 }
 0x91d   : > { %3308 = vmatpush3.bf16.msra.mxu1 %v1187_v51  ;;  %3309 = vmatprep.mubr.msk.bf16.mxu1 %vm3722_vm2, %v3721_v44 }
 0x91e   : > { %3313 = vmatprep.subr.bf16.mxu1 %v3721_v44 }
 0x9ef   : > { %v1176_v53 = vpop.f32.mrb[16].mxu1 }
 0x9f0   : > { %v1182_v54 = vpack.c.bf16 %v1176_v53, %v1176_v53  ;;  %v3305_v55 = vpop.f32.mrb[17].mxu1 }
 0x9f1   : > { %v1179_v57 = vpop.f32.mrb[18].mxu1 }
 0x9f2   : > { %v3306_v58 = vpop.f32.mrb[19].mxu1  ;;  %3310 = vmatmul.mubr.msk.bf16.vlgmr.msra.gmra.mrb[20].mxu1 %vm959_vm3, %v1182_v54  ;;  %v954_v54 = vld [vmem:[%s4449_s9 + $0xc] sm:$0xf] }
 0x9f3   : > { %3314 = vmatpush3.bf16.msra.mxu1 %v1233_v56  ;;  %3315 = vmatprep.mubr.msk.bf16.mxu1 %vm3722_vm2, %v3721_v44 }
 0x9f4   : > { %3319 = vmatprep.subr.bf16.mxu1 %v3721_v44 }
 0x9fa   : > { %3316 = vmatmul.mubr.msk.bf16.vlgmr.msra.gmra.mrb[24].mxu1 %vm959_vm3, %v1069_v59 }
 0x9fb   : > { %3321 = vmatprep.mubr.msk.bf16.mxu1 %vm3722_vm2, %v3721_v44 }
 0x9fc   : > { %3320 = vmatpush3.bf16.xpose.msra.mxu1 %v1283_v62 }
 0x9fd   : > { %3331 = vmatprep.subr.bf16.mxu1 %v3721_v44 }
 0xa03   : > { %3322 = vmatmul.mubr.msk.bf16.vlgmr.msra.gmra.mrb[28].mxu1 %vm959_vm3, %v1276_v63 }
 0xa04   : > { %3333 = vmatprep.mubr.msk.bf16.mxu1 %vm3722_vm2, %v3721_v44  ;;  %3332 = vmatpush3.bf16.msra.mxu1 %v1392_v32  ;;  %v3576_v32 = vld [vmem:[%s4455_s15] sm:$0xff]  }
 0xa05   : > { %3343 = vmatprep.subr.bf16.mxu1 %v3721_v44 }
 0xac5   : > { %v1223_v0 = vpop.f32.mrb[20].mxu1 }
 0xac6   : > { %v3311_v1 = vpop.f32.mrb[21].mxu1 }
 0xac7   : > { %v1226_v2 = vpop.f32.mrb[22].mxu1 }
 0xac8   : > { %v3312_v3 = vpop.f32.mrb[23].mxu1 }
 0xacd   : > { %v1269_v4 = vpop.f32.mrb[24].mxu1 }
 0xace   : > { %v4049_v6 = vadd.f32 %v1269_v4, %v1223_v0  ;;  %v3317_v7 = vpop.f32.mrb[25].mxu1 }
 0xacf   : > { %v1272_v8 = vpop.f32.mrb[26].mxu1 }
 0xad0   : > { %v3318_v9 = vpop.f32.mrb[27].mxu1 }
 0xad6   : > { %v1319_v10 = vpop.f32.mrb[28].mxu1 }
 0xad7   : > { %v1325_v11 = vmul.f32 0.35355338, %v1319_v10  ;;  %v3323_v12 = vpop.f32.mrb[29].mxu1  ;;  %v3095_v10 = vld [vmem:[%s4450_s10] ss:$0 sm:$0xff] }
 0xad8   : > { %v1322_v13 = vpop.f32.mrb[30].mxu1 }
 0xad9   : > { %v3324_v14 = vpop.f32.mrb[31].mxu1  ;;  %v1326_v15 = vadd.f32 %v1325_v11, %v3995_v5 }
 0xadb   : > { %v1327_v16 = vsel %vm959_vm3, %v1326_v15, -inf }
 0xadc   : > { %1328 = vmax.xlane.f32.xlu1 %v1327_v16 }
 0xaed   : > { %1437 = vrot.lane.b32.xlu1 %v3983_v61, %s4474_s23  ;;  %s2974_s23 = scalar_lea.sflag [#allocation3], %s660_s4 }
 0xaf1   : > { %1435 = vrot.lane.b32.xlu1 %v3983_v61, %s4473_s26  ;;  %s4475_s26 = smov 40  }
 0xb69   : > { %v1329_v17 = vpop.xlane.xlu1 %1328 }
 0xb6a   : > { %v1330_v18 = vsub.f32 %v1326_v15, %v1329_v17 }
 0xb6c   : > { %v1331_v19 = vmul.f32 1.442695, %v1330_v18 }
 0xb6d   : > { %v1438_v27 = vpop.permute.xlu1 %1437 }
 0xb6e   : > { %3610 = vpow2.f32 %v1331_v19  ;;  %v1443_v29 = vsel %vm959_vm3, %v1438_v27, 0 }
 0xb71   : > { %v1436_v30 = vpop.permute.xlu1 %1435 }
 0xb78   : > { %v3611_v20 = vpop.eup %3610 }
 0xb79   : > { %v1333_v21 = vsel %vm959_vm3, %v3611_v20, 0.0 }
 0xb7a   : > { %1334 = vadd.xlane.f32.xlu0 %v1333_v21  ;;  %v3574_v21 = vld [vmem:[%s4453_s13] sm:$0xff]  }
 0xb90   : > { %1339 = vrot.lane.b32.xlu0 %v3983_v61, %s4476_s29  ;;  %s4506_s29 = smov 48  }
 0xc07   : > { %v1335_v22 = vpop.xlane.xlu0 %1334 }
 0xc08   : > { %3612 = vrcp.f32 %v1335_v22 }
 0xc0b   : > { %v1340_v23 = vpop.permute.xlu0 %1339 }
 0xc0c   : > { %v1345_v24 = vsel %vm1025_vm5, %v1340_v23, 0 }
 0xc0d   : > { %3326 = vmatpush3.bf16.msra.mxu0 %v1345_v24 }
 0xc0e   : > { %3337 = vmatprep.subr.bf16.mxu0 %v3721_v44 }
 0xc12   : > { %v3613_v25 = vpop.eup %3612 }
 0xc13   : > { %v1337_v26 = vmul.f32 %v3613_v25, %v3611_v20 }
 0xc15   : > { %v1338_v28 = vpack.c.bf16 %v1337_v26, %v1337_v26  ;;  %v3096_v26 = vld [vmem:[%s4451_s11] ss:$0 sm:$0xff] }
 0xc17   : > { %3328 = vmatmul.mubr.msk.bf16.vlgmr.msra.gmra.mrb[4].mxu0 %vm959_vm3, %v1338_v28  ;;  %v3097_v28 = vld [vmem:[%s4452_s12] ss:$0 sm:$0xff] }
 0xc18   : > { %3338 = vmatpush3.bf16.xpose.msra.mxu0 %v1443_v29  ;;  %3339 = vmatprep.mubr.msk.bf16.mxu0 %vm3722_vm2, %v3721_v44 }
 0xc19   : > { %3349 = vmatprep.subr.bf16.mxu0 %v3721_v44 }
 0xc1f   : > { %3340 = vmatmul.mubr.msk.bf16.vlgmr.msra.gmra.mrb[8].mxu0 %vm959_vm3, %v1436_v30 }
 0xc20   : > { %3351 = vmatprep.mubr.msk.bf16.mxu0 %vm3722_vm2, %v3721_v44 }
 0xcea   : > { %v1381_v33 = vpop.f32.mrb[4].mxu0 }
 0xceb   : > { %v1387_v34 = vpack.c.bf16 %v1381_v33, %v1381_v33  ;;  %v3329_v35 = vpop.f32.mrb[5].mxu0  ;;  %v3577_v33 = vld [vmem:[%s4455_s15 + $0x8] sm:$0xff]  }
 0xcec   : > { %v1384_v37 = vpop.f32.mrb[6].mxu0  ;;  %v3579_v35 = vld [vmem:[%s4455_s15 + $0x18] sm:$0xff]  }
 0xced   : > { %v3330_v38 = vpop.f32.mrb[7].mxu0  ;;  %3334 = vmatmul.mubr.msk.bf16.vlgmr.msra.gmra.mrb[32].mxu1 %vm959_vm3, %v1387_v34  ;;  %v3578_v34 = vld [vmem:[%s4455_s15 + $0x10] sm:$0xff]   ;;  %v3580_v37 = vld [vmem:[%s4455_s15 + $0x20] sm:$0xff]  }
 0xcee   : > { %3345 = vmatprep.mubr.msk.bf16.mxu1 %vm3722_vm2, %v3721_v44  ;;  %v3581_v38 = vld [vmem:[%s4455_s15 + $0x28] sm:$0xff]  }
 0xcf2   : > { %v1479_v39 = vpop.f32.mrb[8].mxu0 }
 0xcf3   : > { %v1485_v40 = vmul.f32 0.35355338, %v1479_v39  ;;  %v3341_v41 = vpop.f32.mrb[9].mxu0  ;;  %v3582_v39 = vld [vmem:[%s4455_s15 + $0x30] sm:$0xff]  }
 0xcf4   : > { %v1482_v42 = vpop.f32.mrb[10].mxu0  ;;  %v3098_v41 = vld [vmem:[%s4454_s14] ss:$0 sm:$0xff] }
 0xcf5   : > { %v3342_v43 = vpop.f32.mrb[11].mxu0  ;;  %v1486_v45 = vadd.f32 %v1485_v40, %v3995_v5  ;;  %v3583_v40 = vld [vmem:[%s4455_s15 + $0x38] sm:$0xff]  }
 0xcf7   : > { %v1487_v46 = vsel %vm959_vm3, %v1486_v45, -inf }
 0xcf8   : > { %1488 = vmax.xlane.f32.xlu0 %v1487_v46 }
 0xd0e   : > { %1499 = vrot.lane.b32.xlu0 %v3983_v61, %s4475_s26  ;;  %v1552_v61 = vsel %vm1025_vm5, %v954_v54, 0  ;;  %s4507_s26 = smov 72  }
 0xd0f   : > { %3350 = vmatpush3.bf16.msra.mxu0 %v1552_v61  ;;  %v3103_v61 = vld [vmem:[%s4456_s16] ss:$0 sm:$0xff] }
 0xd10   : > { %3363 = vmatprep.subr.bf16.mxu0 %v3721_v44 }
 0xd85   : > { %v1489_v47 = vpop.xlane.xlu0 %1488 }
 0xd86   : > { %v1490_v48 = vsub.f32 %v1486_v45, %v1489_v47 }
 0xd88   : > { %v1491_v49 = vmul.f32 1.442695, %v1490_v48 }
 0xd89   : > { %v1500_v50 = vpop.permute.xlu0 %1499 }
 0xd8a   : > { %3614 = vpow2.f32 %v1491_v49  ;;  %v1505_v51 = vsel %vm1025_vm5, %v1500_v50, 0 }
 0xd8b   : > { %3344 = vmatpush3.bf16.msra.mxu1 %v1505_v51 }
 0xd8c   : > { %3355 = vmatprep.subr.bf16.mxu1 %v3721_v44 }
 0xd94   : > { %v3615_v52 = vpop.eup %3614 }
 0xd95   : > { %v1493_v53 = vsel %vm959_vm3, %v3615_v52, 0.0 }
 0xd96   : > { %1494 = vadd.xlane.f32.xlu1 %v1493_v53 }
 0xdc0   : > { %v1428_v55 = vpop.f32.mrb[32].mxu1 }
 0xdc1   : > { %v1434_v56 = vadd.f32 %v1428_v55, %v4049_v6  ;;  %v3335_v57 = vpop.f32.mrb[33].mxu1 }
 0xdc2   : > { %v1431_v58 = vpop.f32.mrb[34].mxu1 }
 0xdc3   : > { %v3336_v59 = vpop.f32.mrb[35].mxu1 }
 0xe23   : > { %v1495_v60 = vpop.xlane.xlu1 %1494 }
 0xe24   : > { %3616 = vrcp.f32 %v1495_v60 }
 0xe2e   : > { %v3617_v62 = vpop.eup %3616 }
 0xe2f   : > { %v1497_v63 = vmul.f32 %v3617_v62, %v3615_v52 }
 0xe31   : > { %v1498_v0 = vpack.c.bf16 %v1497_v63, %v1497_v63 }
 0xe33   : > { %3346 = vmatmul.mubr.msk.bf16.vlgmr.msra.gmra.mrb[36].mxu1 %vm959_vm3, %v1498_v0 }
 0xe34   : > { %3359 = vmatprep.mubr.msk.bf16.mxu1 %vm3722_vm2, %v3721_v44  ;;  %3356 = vmatpush3.bf16.msra.mxu1 %v3574_v21 }
 0xe35   : > { %3357 = vmatprep.subr.bf16.mxu1 %v3721_v44 }
 0xf06   : > { %v1541_v1 = vpop.f32.mrb[36].mxu1 }
 0xf07   : > { %v1547_v2 = vpack.c.bf16 %v1541_v1, %v1541_v1  ;;  %v3347_v3 = vpop.f32.mrb[37].mxu1 }
 0xf08   : > { %v1544_v4 = vpop.f32.mrb[38].mxu1 }
 0xf09   : > { %v3348_v7 = vpop.f32.mrb[39].mxu1  ;;  %3352 = vmatmul.mubr.msk.bf16.vlgmr.msra.gmra.mrb[12].mxu0 %vm959_vm3, %v1547_v2  ;;  %v3584_v4 = vld [vmem:[%s4447_s7 + $0x10] sm:$0xff]  }
 0xf0a   : > { %3379 = vmatprep.mubr.msk.bf16.mxu0 %vm3722_vm2, %v3721_v44  ;;  %3364 = vmatpush3.bf16.msra.mxu0 %v3576_v32  ;;  %v3585_v7 = vld [vmem:[%s4447_s7 + $0x18] sm:$0xff]  }
 0xf0b   : > { %3365 = vmatprep.subr.bf16.mxu0 %v3721_v44 }
 0xf0e   : > { %3366 = vmatpush3.bf16.msra.mxu0 %v3577_v33 }
 0xf0f   : > { %3367 = vmatprep.subr.bf16.mxu0 %v3721_v44 }
 0xf12   : > { %3368 = vmatpush3.bf16.msra.mxu0 %v3578_v34 }
 0xf13   : > { %3369 = vmatprep.subr.bf16.mxu0 %v3721_v44 }
 0xf16   : > { %3370 = vmatpush3.bf16.msra.mxu0 %v3579_v35 }
 0xf17   : > { %3371 = vmatprep.subr.bf16.mxu0 %v3721_v44 }
 0xf1a   : > { %3372 = vmatpush3.bf16.msra.mxu0 %v3580_v37 }
 0xf1b   : > { %3373 = vmatprep.subr.bf16.mxu0 %v3721_v44 }
 0xf1e   : > { %3374 = vmatpush3.bf16.msra.mxu0 %v3581_v38 }
 0xf1f   : > { %3375 = vmatprep.subr.bf16.mxu0 %v3721_v44 }
 0xf22   : > { %3376 = vmatpush3.bf16.msra.mxu0 %v3582_v39 }
 0xf23   : > { %3377 = vmatprep.subr.bf16.mxu0 %v3721_v44 }
 0xf26   : > { %3378 = vmatpush3.bf16.msra.mxu0 %v3583_v40 }
 0xf27   : > { %3409 = vmatprep.subr.bf16.mxu0 %v3721_v44 }
 0xfdc   : > { %v1588_v6 = vpop.f32.mrb[12].mxu0 }
 0xfdd   : > { %v1594_v8 = vadd.f32 %v1588_v6, %v1434_v56  ;;  %v3353_v9 = vpop.f32.mrb[13].mxu0 }
 0xfde   : > { %v1591_v11 = vpop.f32.mrb[14].mxu0 }
 0xfdf   : > { %v1595_v12 = vadd.f32 %v1594_v8, %v3951_v36  ;;  %v3354_v13 = vpop.f32.mrb[15].mxu0  ;;  %v3575_v36 = vld [vmem:[%s4453_s13 + $0x8] sm:$0xff]   ;;  %v3114_v11 = vld [vmem:[%s4501_s0 + $0x1] ss:$0 sm:$0xff] }
 0xfe0   : > { %3358 = vmatpush3.bf16.msra.mxu1 %v3575_v36  ;;  %v3115_v13 = vld [vmem:[%s4446_s6 + $0x1] ss:$0 sm:$0xff] }
 0xfe1   : > { %v4101_v14 = vadd.f32 %v3095_v10, %v1595_v12  ;;  %3383 = vmatprep.subr.bf16.mxu1 %v3721_v44 }
 0xfe3   : > { %v1606_v15 = vsel %vm822_vm1, %v4101_v14, 0.0 }
 0xfe4   : > { %1607 = vadd.xlane.f32.xlu1 %v1606_v15 }
0x1071   : > { %v1608_v16 = vpop.xlane.xlu1 %1607 }
0x1072   : > { %v1609_v17 = vmul.f32 0.03125, %v1608_v16 }
0x1074   : > { %v1610_v18 = vsub.f32 %v4101_v14, %v1609_v17  ;;  %v3121_v17 = vld [vmem:[%s4448_s8 + $0x1] ss:$0 sm:$0xff] }
0x1076   : > { %v1611_v19 = vmul.f32 %v1610_v18, %v1610_v18 }
0x1078   : > { %v1612_v20 = vsel %vm822_vm1, %v1611_v19, 0.0 }
0x1079   : > { %1613 = vadd.xlane.f32.xlu1 %v1612_v20 }
0x1106   : > { %v1614_v22 = vpop.xlane.xlu1 %1613 }
0x1107   : > { %v1615_v23 = vmul.f32 0.03125, %v1614_v22 }
0x1109   : > { %v1616_v24 = vadd.f32 1e-05, %v1615_v23 }
0x110b   : > { %3618 = vrsqrt.f32 %v1616_v24 }
0x1115   : > { %v3619_v25 = vpop.eup %3618 }
0x1116   : > { %v1618_v27 = vmul.f32 %v3619_v25, %v1610_v18 }
0x1118   : > { %v1625_v29 = vmul.f32 %v3096_v26, %v1618_v27 }
0x111a   : > { %v1632_v30 = vadd.f32 %v3097_v28, %v1625_v29 }
0x111c   : > { %v1633_v31 = vpack.c.bf16 %v1632_v30, %v1632_v30 }
0x111e   : > { %3360 = vmatmul.mubr.msk.bf16.vlgmr.msra.gmra.mrb[40].mxu1 %vm822_vm1, %v1633_v31 }
0x111f   : > { %3387 = vmatprep.mubr.msk.bf16.mxu1 %vm3722_vm2, %v3721_v44  ;;  %3384 = vmatpush3.bf16.msra.mxu1 %v3584_v4 }
0x1120   : > { %3385 = vmatprep.subr.bf16.mxu1 %v3721_v44 }
0x1123   : > { %3386 = vmatpush3.bf16.msra.mxu1 %v3585_v7 }
0x1124   : > { %3391 = vmatprep.subr.bf16.mxu1 %v3721_v44 }
0x11f1   : > { %v1694_v42 = vpop.f32.mrb[40].mxu1 }
0x11f2   : > { %v1695_v43 = vadd.f32 %v3098_v41, %v1694_v42  ;;  %v3361_v45 = vpop.f32.mrb[41].mxu1 }
0x11f3   : > { %v1697_v46 = vpop.f32.mrb[42].mxu1 }
0x11f4   : > { %v3102_v47 = vmul.f32 -1.702, %v1695_v43  ;;  %v3362_v48 = vpop.f32.mrb[43].mxu1 }
0x11f6   : > { %v1702_v49 = vmul.f32 1.442695, %v3102_v47 }
0x11f8   : > { %3620 = vpow2.f32 %v1702_v49 }
0x1202   : > { %v3621_v50 = vpop.eup %3620 }
0x1203   : > { %v1704_v51 = vadd.f32 1.0, %v3621_v50 }
0x1205   : > { %3622 = vrcp.f32 %v1704_v51 }
0x120f   : > { %v3623_v52 = vpop.eup %3622 }
0x1210   : > { %v1707_v53 = vmul.f32 %v3623_v52, %v1695_v43 }
0x1212   : > { %v1708_v54 = vpack.c.bf16 %v1707_v53, %v1707_v53 }
0x1214   : > { %3380 = vmatmul.mubr.bf16.vlgmr.msra.gmra.mrb[16].mxu0 %v1708_v54 }
0x1215   : > { %3411 = vmatprep.mubr.msk.bf16.mxu0 %vm3722_vm2, %v3721_v44 }
0x12e7   : > { %v1814_v55 = vpop.f32.mrb[16].mxu0 }
0x12e8   : > { %v1815_v56 = vadd.f32 %v3103_v61, %v1814_v55  ;;  %v3381_v57 = vpop.f32.mrb[17].mxu0 }
0x12e9   : > { %v1817_v58 = vpop.f32.mrb[18].mxu0 }
0x12ea   : > { %v4165_v59 = vadd.f32 %v1815_v56, %v4101_v14  ;;  %v3382_v60 = vpop.f32.mrb[19].mxu0 }
0x12ec   : > { %v1825_v62 = vsel %vm822_vm1, %v4165_v59, 0.0 }
0x12ed   : > { %1826 = vadd.xlane.f32.xlu1 %v1825_v62 }
0x137a   : > { %v1827_v63 = vpop.xlane.xlu1 %1826 }
0x137b   : > { %v1828_v0 = vmul.f32 0.03125, %v1827_v63 }
0x137d   : > { %v1829_v1 = vsub.f32 %v4165_v59, %v1828_v0 }
0x137f   : > { %v1830_v2 = vmul.f32 %v1829_v1, %v1829_v1 }
0x1381   : > { %v1831_v3 = vsel %vm822_vm1, %v1830_v2, 0.0 }
0x1382   : > { %1832 = vadd.xlane.f32.xlu1 %v1831_v3 }
0x140f   : > { %v1833_v6 = vpop.xlane.xlu1 %1832 }
0x1410   : > { %v1834_v8 = vmul.f32 0.03125, %v1833_v6 }
0x1412   : > { %v1835_v9 = vadd.f32 1e-05, %v1834_v8  ;;  %v3125_v8 = vld [vmem:[%s4449_s9 + $0x10] sm:$0xf] }
0x1414   : > { %3624 = vrsqrt.f32 %v1835_v9 }
0x141e   : > { %v3625_v10 = vpop.eup %3624 }
0x141f   : > { %v1837_v12 = vmul.f32 %v3625_v10, %v1829_v1  ;;  %v3126_v1 = vld [vmem:[%s4449_s9 + $0x14] sm:$0xf] }
0x1420   : > { %v2156_v2 = vsel %vm1025_vm5, %v3126_v1, 0 }
0x1421   : > { %v1844_v14 = vmul.f32 %v3114_v11, %v1837_v12  ;;  %v2202_v11 = vsel %vm1025_vm5, %v3125_v8, 0 }
0x1423   : > { %v1851_v15 = vadd.f32 %v3115_v13, %v1844_v14 }
0x1425   : > { %v1852_v16 = vpack.c.bf16 %v1851_v15, %v1851_v15 }
0x1427   : > { %3388 = vmatmul.mubr.msk.bf16.vlgmr.msra.gmra.mrb[44].mxu1 %vm822_vm1, %v1852_v16 }
0x1428   : > { %3393 = vmatprep.mubr.msk.bf16.mxu1 %vm3722_vm2, %v3721_v44 }
0x14fa   : > { %v1915_v18 = vpop.f32.mrb[44].mxu1 }
0x14fb   : > { %v1916_v19 = vadd.f32 %v3121_v17, %v1915_v18  ;;  %v3389_v20 = vpop.f32.mrb[45].mxu1 }
0x14fc   : > { %v1918_v21 = vpop.f32.mrb[46].mxu1 }
0x14fd   : > { %v4191_v36 = vpack.c.bf16 %v1916_v19, %v1916_v19  ;;  %v3390_v22 = vpop.f32.mrb[47].mxu1 }
0x14ff   : > { %1928 = vrot.lane.b32.xlu0 %v4191_v36, %s3723_s21  ;;  %s4502_s21 = smov 120  }
0x1571   : > { %v1929_v23 = vpop.permute.xlu0 %1928 }
0x1572   : > { %v1934_v24 = vsel %vm959_vm3, %v1929_v23, 0 }
0x1573   : > { %3392 = vmatpush3.bf16.xpose.msra.mxu1 %v1934_v24 }
0x1574   : > { %3397 = vmatprep.subr.bf16.mxu1 %v3721_v44 }
0x157a   : > { %3394 = vmatmul.mubr.msk.bf16.vlgmr.msra.gmra.mrb[48].mxu1 %vm959_vm3, %v4191_v36 }
0x157b   : > { %3399 = vmatprep.mubr.msk.bf16.mxu1 %vm3722_vm2, %v3721_v44 }
0x164d   : > { %v1970_v25 = vpop.f32.mrb[48].mxu1 }
0x164e   : > { %v1976_v26 = vmul.f32 0.35355338, %v1970_v25  ;;  %v3395_v27 = vpop.f32.mrb[49].mxu1 }
0x164f   : > { %v1973_v28 = vpop.f32.mrb[50].mxu1 }
0x1650   : > { %v3396_v29 = vpop.f32.mrb[51].mxu1  ;;  %v1977_v30 = vadd.f32 %v1976_v26, %v3995_v5 }
0x1652   : > { %v1978_v31 = vsel %vm959_vm3, %v1977_v30, -inf }
0x1653   : > { %1979 = vmax.xlane.f32.xlu1 %v1978_v31 }
0x1664   : > { %1990 = vrot.lane.b32.xlu1 %v4191_v36, %s3726_s2  ;;  %s4504_s2 = smov 80  }
0x1668   : > { %2041 = vrot.lane.b32.xlu1 %v4191_v36, %s3724_s27  ;;  %s4503_s27 = smov 56  }
0x166c   : > { %2039 = vrot.lane.b32.xlu1 %v4191_v36, %s4502_s21  ;;  %s4508_s21 = smov 104  }
0x16e0   : > { %v1980_v32 = vpop.xlane.xlu1 %1979 }
0x16e1   : > { %v1981_v33 = vsub.f32 %v1977_v30, %v1980_v32 }
0x16e3   : > { %v1982_v34 = vmul.f32 1.442695, %v1981_v33 }
0x16e4   : > { %v1991_v35 = vpop.permute.xlu1 %1990 }
0x16e5   : > { %3626 = vpow2.f32 %v1982_v34  ;;  %v1996_v37 = vsel %vm1025_vm5, %v1991_v35, 0 }
0x16e6   : > { %3398 = vmatpush3.bf16.msra.mxu1 %v1996_v37 }
0x16e7   : > { %3403 = vmatprep.subr.bf16.mxu1 %v3721_v44 }
0x16e8   : > { %v2042_v43 = vpop.permute.xlu1 %2041 }
0x16e9   : > { %v2047_v46 = vsel %vm959_vm3, %v2042_v43, 0 }
0x16ec   : > { %v2040_v47 = vpop.permute.xlu1 %2039 }
0x16ef   : > { %v3627_v38 = vpop.eup %3626 }
0x16f0   : > { %v1984_v39 = vsel %vm959_vm3, %v3627_v38, 0.0 }
0x16f1   : > { %1985 = vadd.xlane.f32.xlu0 %v1984_v39 }
0x177e   : > { %v1986_v40 = vpop.xlane.xlu0 %1985 }
0x177f   : > { %3628 = vrcp.f32 %v1986_v40 }
0x1789   : > { %v3629_v41 = vpop.eup %3628 }
0x178a   : > { %v1988_v42 = vmul.f32 %v3629_v41, %v3627_v38 }
0x178c   : > { %v1989_v45 = vpack.c.bf16 %v1988_v42, %v1988_v42 }
0x178e   : > { %3400 = vmatmul.mubr.msk.bf16.vlgmr.msra.gmra.mrb[52].mxu1 %vm959_vm3, %v1989_v45 }
0x178f   : > { %3404 = vmatpush3.bf16.xpose.msra.mxu1 %v2047_v46  ;;  %3405 = vmatprep.mubr.msk.bf16.mxu1 %vm3722_vm2, %v3721_v44 }
0x1790   : > { %3415 = vmatprep.subr.bf16.mxu1 %v3721_v44 }
0x1796   : > { %3406 = vmatmul.mubr.msk.bf16.vlgmr.msra.gmra.mrb[56].mxu1 %vm959_vm3, %v2040_v47 }
0x1797   : > { %3417 = vmatprep.mubr.msk.bf16.mxu1 %vm3722_vm2, %v3721_v44  ;;  %3416 = vmatpush3.bf16.msra.mxu1 %v2156_v2 }
0x1798   : > { %3427 = vmatprep.subr.bf16.mxu1 %v3721_v44 }
0x1861   : > { %v2032_v48 = vpop.f32.mrb[52].mxu1 }
0x1862   : > { %v3401_v49 = vpop.f32.mrb[53].mxu1  ;;  %v2038_v12 = vpack.c.bf16 %v2032_v48, %v2032_v48 }
0x1863   : > { %v2035_v50 = vpop.f32.mrb[54].mxu1 }
0x1864   : > { %v3402_v51 = vpop.f32.mrb[55].mxu1 }
0x1869   : > { %v2083_v52 = vpop.f32.mrb[56].mxu1 }
0x186a   : > { %v2089_v53 = vmul.f32 0.35355338, %v2083_v52  ;;  %v3407_v54 = vpop.f32.mrb[57].mxu1 }
0x186b   : > { %v2086_v61 = vpop.f32.mrb[58].mxu1 }
0x186c   : > { %v3408_v55 = vpop.f32.mrb[59].mxu1  ;;  %v2090_v56 = vadd.f32 %v2089_v53, %v3995_v5  ;;  %v3127_v53 = vld [vmem:[%s4449_s9 + $0x18] sm:$0xf] }
0x186d   : > { %v2361_v54 = vsel %vm1025_vm5, %v3127_v53, 0  ;;  %v3588_v53 = vld [vmem:[%s4455_s15 + $0x40] sm:$0xff]  }
0x186e   : > { %v2091_v57 = vsel %vm959_vm3, %v2090_v56, -inf }
0x186f   : > { %2092 = vmax.xlane.f32.xlu1 %v2091_v57 }
0x18fc   : > { %v2093_v58 = vpop.xlane.xlu1 %2092 }
0x18fd   : > { %v2094_v60 = vsub.f32 %v2090_v56, %v2093_v58 }
0x18ff   : > { %v2095_v62 = vmul.f32 1.442695, %v2094_v60 }
0x1901   : > { %3630 = vpow2.f32 %v2095_v62 }
0x190b   : > { %v3631_v63 = vpop.eup %3630 }
0x190c   : > { %v2097_v0 = vsel %vm959_vm3, %v3631_v63, 0.0 }
0x190d   : > { %2098 = vadd.xlane.f32.xlu0 %v2097_v0 }
0x1923   : > { %2103 = vrot.lane.b32.xlu0 %v4191_v36, %s4503_s27 }
0x1927   : > { %2246 = vrot.lane.b32.xlu0 %v4191_v36, %s4504_s2 }
0x192b   : > { %2244 = vrot.lane.b32.xlu0 %v4191_v36, %s4505_s28  ;;  %s4509_s28 = smov 40  }
0x199a   : > { %v2099_v3 = vpop.xlane.xlu0 %2098 }
0x199b   : > { %3632 = vrcp.f32 %v2099_v3 }
0x199e   : > { %v2104_v4 = vpop.permute.xlu0 %2103 }
0x199f   : > { %v2109_v7 = vsel %vm1025_vm5, %v2104_v4, 0 }
0x19a0   : > { %3410 = vmatpush3.bf16.msra.mxu0 %v2109_v7 }
0x19a1   : > { %3421 = vmatprep.subr.bf16.mxu0 %v3721_v44 }
0x19a2   : > { %v2247_v13 = vpop.permute.xlu0 %2246 }
0x19a3   : > { %v2252_v18 = vsel %vm959_vm3, %v2247_v13, 0 }
0x19a5   : > { %v3633_v6 = vpop.eup %3632 }
0x19a6   : > { %v2101_v9 = vmul.f32 %v3633_v6, %v3631_v63  ;;  %v2245_v22 = vpop.permute.xlu0 %2244 }
0x19a8   : > { %v2102_v10 = vpack.c.bf16 %v2101_v9, %v2101_v9 }
0x19aa   : > { %3412 = vmatmul.mubr.msk.bf16.vlgmr.msra.gmra.mrb[20].mxu0 %vm959_vm3, %v2102_v10  ;;  %v3128_v10 = vld [vmem:[%s4449_s9 + $0x1c] sm:$0xf] }
0x19ab   : > { %3422 = vmatpush3.bf16.msra.mxu0 %v2202_v11  ;;  %3423 = vmatprep.mubr.msk.bf16.mxu0 %vm3722_vm2, %v3721_v44 }
0x19ac   : > { %3433 = vmatprep.subr.bf16.mxu0 %v3721_v44 }
0x19b2   : > { %3424 = vmatmul.mubr.msk.bf16.vlgmr.msra.gmra.mrb[24].mxu0 %vm959_vm3, %v2038_v12 }
0x19b3   : > { %3435 = vmatprep.mubr.msk.bf16.mxu0 %vm3722_vm2, %v3721_v44 }
0x1a7d   : > { %v2145_v14 = vpop.f32.mrb[20].mxu0 }
0x1a7e   : > { %v2151_v15 = vpack.c.bf16 %v2145_v14, %v2145_v14  ;;  %v3413_v16 = vpop.f32.mrb[21].mxu0 }
0x1a7f   : > { %v2148_v17 = vpop.f32.mrb[22].mxu0 }
0x1a80   : > { %v3414_v19 = vpop.f32.mrb[23].mxu0  ;;  %3418 = vmatmul.mubr.msk.bf16.vlgmr.msra.gmra.mrb[60].mxu1 %vm959_vm3, %v2151_v15 }
0x1a81   : > { %3428 = vmatpush3.bf16.xpose.msra.mxu1 %v2252_v18  ;;  %3429 = vmatprep.mubr.msk.bf16.mxu1 %vm3722_vm2, %v3721_v44 }
0x1a82   : > { %3439 = vmatprep.subr.bf16.mxu1 %v3721_v44 }
0x1a85   : > { %v2238_v20 = vpop.f32.mrb[24].mxu0 }
0x1a86   : > { %v3425_v21 = vpop.f32.mrb[25].mxu0 }
0x1a87   : > { %v2241_v23 = vpop.f32.mrb[26].mxu0 }
0x1a88   : > { %v3426_v24 = vpop.f32.mrb[27].mxu0  ;;  %3430 = vmatmul.mubr.msk.bf16.vlgmr.msra.gmra.mrb[64].mxu1 %vm959_vm3, %v2245_v22 }
0x1a89   : > { %3441 = vmatprep.mubr.msk.bf16.mxu1 %vm3722_vm2, %v3721_v44  ;;  %3440 = vmatpush3.bf16.msra.mxu1 %v2361_v54  ;;  %v3589_v54 = vld [vmem:[%s4455_s15 + $0x48] sm:$0xff]  }
0x1a8a   : > { %3451 = vmatprep.subr.bf16.mxu1 %v3721_v44 }
0x1b53   : > { %v2192_v25 = vpop.f32.mrb[60].mxu1 }
0x1b54   : > { %v4255_v26 = vadd.f32 %v2238_v20, %v2192_v25  ;;  %v3419_v27 = vpop.f32.mrb[61].mxu1 }
0x1b55   : > { %v2195_v28 = vpop.f32.mrb[62].mxu1 }
0x1b56   : > { %v3420_v29 = vpop.f32.mrb[63].mxu1 }
0x1b57   : > { %v3142_v29 = vld [vmem:[%s4450_s10 + $0x1] ss:$0 sm:$0xff] }
0x1b5b   : > { %v2288_v30 = vpop.f32.mrb[64].mxu1 }
0x1b5c   : > { %v2294_v31 = vmul.f32 0.35355338, %v2288_v30  ;;  %v3431_v32 = vpop.f32.mrb[65].mxu1 }
0x1b5d   : > { %v2291_v33 = vpop.f32.mrb[66].mxu1 }
0x1b5e   : > { %v3432_v34 = vpop.f32.mrb[67].mxu1  ;;  %v2295_v35 = vadd.f32 %v2294_v31, %v3995_v5 }
0x1b60   : > { %v2296_v37 = vsel %vm959_vm3, %v2295_v35, -inf }
0x1b61   : > { %2297 = vmax.xlane.f32.xlu1 %v2296_v37 }
0x1b72   : > { %2308 = vrot.lane.b32.xlu1 %v4191_v36, %s4506_s29  ;;  %s3188_s29 = sshll.u32 %s3867_s3, 4  ;;  %s3735_s3 = smov [#allocation2]  }
0x1b76   : > { %2406 = vrot.lane.b32.xlu1 %v4191_v36, %s4507_s26  ;;  %s661_s26 = scalar_lea.vmem [#allocation2], %s660_s4 }
0x1b7a   : > { %2404 = vrot.lane.b32.xlu1 %v4191_v36, %s4508_s21  ;;  %s2986_s21 = sshll.u32 %s661_s26, 4  ;;  %s4399_s21 = int_to_ptr.vmem [resolvable:$true] %s2986_s21 }
0x1b7b   : > { %s3656_s22 = scalar_lea.vmem %s4399_s21, 16 }
0x1b7c   : > { %p3657_p11 = scmp.ne.s32.totalorder %s4399_s21, %s3656_s22 }
0x1b7e   : > { %p3658_p12 = pnand %p3657_p11, %p3884_p5 }
0x1b80   : > { %p3659_p13 = pneg %p3658_p12 }
0x1bee   : > { %v2298_v38 = vpop.xlane.xlu1 %2297 }
0x1bef   : > { %v2299_v39 = vsub.f32 %v2295_v35, %v2298_v38 }
0x1bf1   : > { %v2300_v40 = vmul.f32 1.442695, %v2299_v39 }
0x1bf2   : > { %v2309_v41 = vpop.permute.xlu1 %2308 }
0x1bf3   : > { %3634 = vpow2.f32 %v2300_v40  ;;  %v2314_v42 = vsel %vm1025_vm5, %v2309_v41, 0  ;;  %v3586_v41 = vld [vmem:[%s4453_s13 + $0x10] sm:$0xff]  }
0x1bf4   : > { %3434 = vmatpush3.bf16.msra.mxu0 %v2314_v42 }
0x1bf5   : > { %3445 = vmatprep.subr.bf16.mxu0 %v3721_v44 }
0x1bf6   : > { %v2407_v49 = vpop.permute.xlu1 %2406 }
0x1bf7   : > { %v2412_v51 = vsel %vm959_vm3, %v2407_v49, 0  ;;  %v3146_v49 = vld [vmem:[%s4452_s12 + $0x1] ss:$0 sm:$0xff] }
0x1bfa   : > { %v2405_v52 = vpop.permute.xlu1 %2404 }
0x1bfd   : > { %v3635_v43 = vpop.eup %3634 }
0x1bfe   : > { %v2302_v45 = vsel %vm959_vm3, %v3635_v43, 0.0 }
0x1bff   : > { %2303 = vadd.xlane.f32.xlu0 %v2302_v45 }
0x1c8c   : > { %v2304_v46 = vpop.xlane.xlu0 %2303 }
0x1c8d   : > { %3636 = vrcp.f32 %v2304_v46 }
0x1c97   : > { %v3637_v47 = vpop.eup %3636 }
0x1c98   : > { %v2306_v48 = vmul.f32 %v3637_v47, %v3635_v43  ;;  %v3145_v47 = vld [vmem:[%s4451_s11 + $0x1] ss:$0 sm:$0xff] }
0x1c9a   : > { %v2307_v50 = vpack.c.bf16 %v2306_v48, %v2306_v48 }
0x1c9c   : > { %3436 = vmatmul.mubr.msk.bf16.vlgmr.msra.gmra.mrb[28].mxu0 %vm959_vm3, %v2307_v50 }
0x1c9d   : > { %3446 = vmatpush3.bf16.xpose.msra.mxu0 %v2412_v51  ;;  %3447 = vmatprep.mubr.msk.bf16.mxu0 %vm3722_vm2, %v3721_v44 }
0x1c9e   : > { %3457 = vmatprep.subr.bf16.mxu0 %v3721_v44 }
0x1ca4   : > { %3448 = vmatmul.mubr.msk.bf16.vlgmr.msra.gmra.mrb[32].mxu0 %vm959_vm3, %v2405_v52 }
0x1ca5   : > { %3459 = vmatprep.mubr.msk.bf16.mxu0 %vm3722_vm2, %v3721_v44 }
0x1d6f   : > { %v2350_v61 = vpop.f32.mrb[28].mxu0 }
0x1d70   : > { %v2356_v55 = vpack.c.bf16 %v2350_v61, %v2350_v61  ;;  %v3437_v56 = vpop.f32.mrb[29].mxu0  ;;  %v3590_v61 = vld [vmem:[%s4455_s15 + $0x50] sm:$0xff]  }
0x1d71   : > { %v2353_v57 = vpop.f32.mrb[30].mxu0  ;;  %v3592_v56 = vld [vmem:[%s4455_s15 + $0x60] sm:$0xff]  }
0x1d72   : > { %v3438_v58 = vpop.f32.mrb[31].mxu0  ;;  %3442 = vmatmul.mubr.msk.bf16.vlgmr.msra.gmra.mrb[68].mxu1 %vm959_vm3, %v2356_v55  ;;  %v3591_v55 = vld [vmem:[%s4455_s15 + $0x58] sm:$0xff]   ;;  %v3593_v57 = vld [vmem:[%s4455_s15 + $0x68] sm:$0xff]  }
0x1d73   : > { %3453 = vmatprep.mubr.msk.bf16.mxu1 %vm3722_vm2, %v3721_v44  ;;  %v3594_v58 = vld [vmem:[%s4455_s15 + $0x70] sm:$0xff]  }
0x1d77   : > { %v2448_v60 = vpop.f32.mrb[32].mxu0 }
0x1d78   : > { %v2454_v62 = vmul.f32 0.35355338, %v2448_v60  ;;  %v3449_v63 = vpop.f32.mrb[33].mxu0  ;;  %v3595_v60 = vld [vmem:[%s4455_s15 + $0x78] sm:$0xff]  }
0x1d79   : > { %v2451_v0 = vpop.f32.mrb[34].mxu0 }
0x1d7a   : > { %v3450_v1 = vpop.f32.mrb[35].mxu0  ;;  %v2455_v2 = vadd.f32 %v2454_v62, %v3995_v5  ;;  %v2521_v5 = vsel %vm1025_vm5, %v3128_v10, 0  ;;  %v3152_v62 = vld [vmem:[%s4454_s14 + $0x1] ss:$0 sm:$0xff] }
0x1d7b   : > { %3458 = vmatpush3.bf16.msra.mxu0 %v2521_v5 }
0x1d7c   : > { %v2456_v3 = vsel %vm959_vm3, %v2455_v2, -inf  ;;  %3471 = vmatprep.subr.bf16.mxu0 %v3721_v44 }
0x1d7d   : > { %2457 = vmax.xlane.f32.xlu1 %v2456_v3 }
0x1e0a   : > { %v2458_v4 = vpop.xlane.xlu1 %2457 }
0x1e0b   : > { %v2459_v7 = vsub.f32 %v2455_v2, %v2458_v4 }
0x1e0d   : > { %v2460_v6 = vmul.f32 1.442695, %v2459_v7 }
0x1e0f   : > { %3638 = vpow2.f32 %v2460_v6 }
0x1e19   : > { %v3639_v8 = vpop.eup %3638 }
0x1e1a   : > { %v2462_v9 = vsel %vm959_vm3, %v3639_v8, 0.0 }
0x1e1b   : > { %2463 = vadd.xlane.f32.xlu0 %v2462_v9 }
0x1e31   : > { %2468 = vrot.lane.b32.xlu0 %v4191_v36, %s4509_s28  ;;  %s4511_s28 = sld [smem:[#allocation17_spill]] }
0x1e37   : > { %s4397_s30 = scalar_lea.hbm %s4511_s28, %s3188_s29 }
0x1e45   : > { %v2397_v11 = vpop.f32.mrb[68].mxu1 }
0x1e46   : > { %v2403_v12 = vadd.f32 %v2397_v11, %v4255_v26  ;;  %v3443_v13 = vpop.f32.mrb[69].mxu1  ;;  %v3174_v11 = vld [vmem:[%s4456_s16 + $0x1] ss:$0 sm:$0xff] }
0x1e47   : > { %v2400_v14 = vpop.f32.mrb[70].mxu1 }
0x1e48   : > { %v3444_v15 = vpop.f32.mrb[71].mxu1 }
0x1ea8   : > { %v2464_v16 = vpop.xlane.xlu0 %2463 }
0x1ea9   : > { %3640 = vrcp.f32 %v2464_v16 }
0x1eac   : > { %v2469_v17 = vpop.permute.xlu0 %2468 }
0x1ead   : > { %v2474_v36 = vsel %vm1025_vm5, %v2469_v17, 0 }
0x1eae   : > { %3452 = vmatpush3.bf16.msra.mxu1 %v2474_v36 }
0x1eaf   : > { %3463 = vmatprep.subr.bf16.mxu1 %v3721_v44 }
0x1eb3   : > { %v3641_v18 = vpop.eup %3640 }
0x1eb4   : > { %v2466_v19 = vmul.f32 %v3641_v18, %v3639_v8 }
0x1eb6   : > { %v2467_v20 = vpack.c.bf16 %v2466_v19, %v2466_v19 }
0x1eb8   : > { %3454 = vmatmul.mubr.msk.bf16.vlgmr.msra.gmra.mrb[72].mxu1 %vm959_vm3, %v2467_v20 }
0x1eb9   : > { %3467 = vmatprep.mubr.msk.bf16.mxu1 %vm3722_vm2, %v3721_v44  ;;  %3464 = vmatpush3.bf16.msra.mxu1 %v3586_v41 }
0x1eba   : > { %3465 = vmatprep.subr.bf16.mxu1 %v3721_v44 }
0x1f8b   : > { %v2510_v21 = vpop.f32.mrb[72].mxu1 }
0x1f8c   : > { %v2516_v22 = vpack.c.bf16 %v2510_v21, %v2510_v21  ;;  %v3455_v23 = vpop.f32.mrb[73].mxu1 }
0x1f8d   : > { %v2513_v24 = vpop.f32.mrb[74].mxu1  ;;  %v3596_v23 = vld [vmem:[%s4459_s19] sm:$0xff]  }
0x1f8e   : > { %v3456_v25 = vpop.f32.mrb[75].mxu1  ;;  %3460 = vmatmul.mubr.msk.bf16.vlgmr.msra.gmra.mrb[36].mxu0 %vm959_vm3, %v2516_v22  ;;  %v3597_v24 = vld [vmem:[%s4459_s19 + $0x8] sm:$0xff]  }
0x1f8f   : > { %3487 = vmatprep.mubr.msk.bf16.mxu0 %vm3722_vm2, %v3721_v44  ;;  %3472 = vmatpush3.bf16.msra.mxu0 %v3588_v53 }
0x1f90   : > { %3473 = vmatprep.subr.bf16.mxu0 %v3721_v44 }
0x1f93   : > { %3474 = vmatpush3.bf16.msra.mxu0 %v3589_v54 }
0x1f94   : > { %3475 = vmatprep.subr.bf16.mxu0 %v3721_v44 }
0x1f97   : > { %3476 = vmatpush3.bf16.msra.mxu0 %v3590_v61 }
0x1f98   : > { %3477 = vmatprep.subr.bf16.mxu0 %v3721_v44 }
0x1f9b   : > { %3478 = vmatpush3.bf16.msra.mxu0 %v3591_v55 }
0x1f9c   : > { %3479 = vmatprep.subr.bf16.mxu0 %v3721_v44 }
0x1f9f   : > { %3480 = vmatpush3.bf16.msra.mxu0 %v3592_v56 }
0x1fa0   : > { %3481 = vmatprep.subr.bf16.mxu0 %v3721_v44 }
0x1fa3   : > { %3482 = vmatpush3.bf16.msra.mxu0 %v3593_v57 }
0x1fa4   : > { %3483 = vmatprep.subr.bf16.mxu0 %v3721_v44 }
0x1fa7   : > { %3484 = vmatpush3.bf16.msra.mxu0 %v3594_v58 }
0x1fa8   : > { %3485 = vmatprep.subr.bf16.mxu0 %v3721_v44 }
0x1fab   : > { %3486 = vmatpush3.bf16.msra.mxu0 %v3595_v60 }
0x2061   : > { %v2557_v26 = vpop.f32.mrb[36].mxu0 }
0x2062   : > { %v2563_v27 = vadd.f32 %v2557_v26, %v2403_v12  ;;  %v3461_v28 = vpop.f32.mrb[37].mxu0 }
0x2063   : > { %v2560_v30 = vpop.f32.mrb[38].mxu0 }
0x2064   : > { %v2564_v31 = vadd.f32 %v2563_v27, %v4165_v59  ;;  %v3462_v32 = vpop.f32.mrb[39].mxu0  ;;  %v3587_v59 = vld [vmem:[%s4453_s13 + $0x18] sm:$0xff]  }
0x2065   : > { %3466 = vmatpush3.bf16.msra.mxu1 %v3587_v59  ;;  %v2882_v59 = vld [vmem:[%s670_s1] sm:$0xff]  ;;  %s3660_s1 = sshll.u32 %s3735_s3, 4  ;;  %s3661_s1 = int_to_ptr.vmem [resolvable:$false] %s3660_s1 }
0x2066   : > { %v4307_v33 = vadd.f32 %v3142_v29, %v2564_v31  ;;  %3491 = vmatprep.subr.bf16.mxu1 %v3721_v44  ;;  %v2797_v29 = vld [vmem:[%s4457_s17] sm:$0x1]  ;;  %s3662_s0 = scalar_lea.vmem %s3661_s1, 32  ;;  %p3663_p0 = scmp.lt.s32.totalorder %s4399_s21, %s3661_s1 }
0x2067   : > { %v2798_v31 = vld [vmem:[%s4458_s18] sm:$0x1]  ;;  %p3664_p1 = scmp.lt.s32.totalorder %s3662_s0, %s3656_s22 }
0x2068   : > { %v2578_v34 = vsel %vm822_vm1, %v4307_v33, 0.0 }
0x2069   : > { %2579 = vadd.xlane.f32.xlu0 %v2578_v34  ;;  %p3665_p2 = por %p3664_p1, %p3663_p0 }
0x206b   : > { %p3666_p3 = pnand %p3665_p2, %p3659_p13 }
0x20f6   : > { %v2580_v35 = vpop.xlane.xlu0 %2579 }
0x20f7   : > { %v2581_v37 = vmul.f32 0.03125, %v2580_v35 }
0x20f9   : > { %v2582_v38 = vsub.f32 %v4307_v33, %v2581_v37 }
0x20fb   : > { %v2583_v39 = vmul.f32 %v2582_v38, %v2582_v38 }
0x20fd   : > { %v2584_v40 = vsel %vm822_vm1, %v2583_v39, 0.0 }
0x20fe   : > { %2585 = vadd.xlane.f32.xlu1 %v2584_v40 }
0x218b   : > { %v2586_v42 = vpop.xlane.xlu1 %2585 }
0x218c   : > { %v2587_v43 = vmul.f32 0.03125, %v2586_v42 }
0x218e   : > { %v2588_v45 = vadd.f32 1e-05, %v2587_v43 }
0x2190   : > { %3642 = vrsqrt.f32 %v2588_v45 }
0x219a   : > { %v3643_v46 = vpop.eup %3642 }
0x219b   : > { %v2590_v48 = vmul.f32 %v3643_v46, %v2582_v38 }
0x219d   : > { %v2597_v50 = vmul.f32 %v3145_v47, %v2590_v48 }
0x219f   : > { %v2604_v51 = vadd.f32 %v3146_v49, %v2597_v50 }
0x21a1   : > { %v2605_v52 = vpack.c.bf16 %v2604_v51, %v2604_v51 }
0x21a3   : > { %3468 = vmatmul.mubr.msk.bf16.vlgmr.msra.gmra.mrb[76].mxu1 %vm822_vm1, %v2605_v52 }
0x21a4   : > { %3495 = vmatprep.mubr.msk.bf16.mxu1 %vm3722_vm2, %v3721_v44  ;;  %3492 = vmatpush3.bf16.msra.mxu1 %v3596_v23 }
0x21a5   : > { %3493 = vmatprep.subr.bf16.mxu1 %v3721_v44 }
0x21a8   : > { %3494 = vmatpush3.bf16.msra.mxu1 %v3597_v24 }
0x21a9   : > { %3499 = vmatprep.subr.mxu1 %v3721_v44 }
0x2276   : > { %v2668_v63 = vpop.f32.mrb[76].mxu1 }
0x2277   : > { %v2669_v0 = vadd.f32 %v3152_v62, %v2668_v63  ;;  %v3469_v1 = vpop.f32.mrb[77].mxu1 }
0x2278   : > { %v2671_v2 = vpop.f32.mrb[78].mxu1 }
0x2279   : > { %v3156_v3 = vmul.f32 -1.702, %v2669_v0  ;;  %v3470_v4 = vpop.f32.mrb[79].mxu1 }
0x227b   : > { %v2676_v7 = vmul.f32 1.442695, %v3156_v3 }
0x227d   : > { %3644 = vpow2.f32 %v2676_v7 }
0x2287   : > { %v3645_v6 = vpop.eup %3644 }
0x2288   : > { %v2678_v8 = vadd.f32 1.0, %v3645_v6 }
0x228a   : > { %3646 = vrcp.f32 %v2678_v8 }
0x2294   : > { %v3647_v9 = vpop.eup %3646 }
0x2295   : > { %v2681_v10 = vmul.f32 %v3647_v9, %v2669_v0 }
0x2297   : > { %v2682_v5 = vpack.c.bf16 %v2681_v10, %v2681_v10 }
0x2299   : > { %3488 = vmatmul.mubr.bf16.vlgmr.msra.gmra.mrb[40].mxu0 %v2682_v5 }
0x236c   : > { %v2790_v12 = vpop.f32.mrb[40].mxu0 }
0x236d   : > { %v2791_v13 = vadd.f32 %v3174_v11, %v2790_v12  ;;  %v3489_v14 = vpop.f32.mrb[41].mxu0 }
0x236e   : > { %v2793_v15 = vpop.f32.mrb[42].mxu0 }
0x236f   : > { %v3490_v16 = vpop.f32.mrb[43].mxu0  ;;  %v2796_v17 = vadd.f32 %v2791_v13, %v4307_v33 }
0x2371   : > { %v2800_v36 = vsel %vm2799_vm6, %v2796_v17, 0.0 }
0x2372   : > { %2801 = vadd.xlane.f32.xlu1 %v2800_v36 }
0x23ff   : > { %v2802_v18 = vpop.xlane.xlu1 %2801 }
0x2400   : > { %v2803_v19 = vmul.f32 0.03125, %v2802_v18 }
0x2402   : > { %v2804_v20 = vsub.f32 %v2796_v17, %v2803_v19 }
0x2404   : > { %v2805_v21 = vmul.f32 %v2804_v20, %v2804_v20 }
0x2406   : > { %v2806_v22 = vsel %vm2799_vm6, %v2805_v21, 0.0 }
0x2407   : > { %2807 = vadd.xlane.f32.xlu1 %v2806_v22 }
0x2494   : > { %v2808_v25 = vpop.xlane.xlu1 %2807 }
0x2495   : > { %v2809_v26 = vmul.f32 0.03125, %v2808_v25 }
0x2497   : > { %v2810_v27 = vadd.f32 1e-05, %v2809_v26 }
0x2499   : > { %3648 = vrsqrt.f32 %v2810_v27 }
0x24a3   : > { %v3649_v28 = vpop.eup %3648 }
0x24a4   : > { %v2812_v30 = vmul.f32 %v3649_v28, %v2804_v20 }
0x24a6   : > { %v2813_v32 = vmul.f32 %v2812_v30, %v2797_v29 }
0x24a8   : > { %v2814_v33 = vadd.f32 %v2813_v32, %v2798_v31 }
0x24aa   : > { %v2815_v34 = vpack.c.bf16 %v2814_v33, %v2814_v33 }
0x24ac   : > { %3496 = vmatmul.mubr.msk.bf16.vlgmr.msra.gmra.mrb[80].mxu1 %vm822_vm1, %v2815_v34 }
0x24ad   : > { %3501 = vmatprep.mubr.msk.f32.mxu1 %vm3722_vm2, %v3721_v44  ;;  %3500 = vmatpush3.xpose.msk.msra.mxu1 %vm2883_vm8, %v2882_v59 }
0x257f   : > { %v2869_v35 = vpop.f32.mrb[80].mxu1 }
0x2580   : > { %v2875_v37 = vmul.f32 %v2869_v35, %v2869_v35  ;;  %v3497_v38 = vpop.f32.mrb[81].mxu1 }
0x2581   : > { %v2872_v39 = vpop.f32.mrb[82].mxu1 }
0x2582   : > { %v3498_v40 = vpop.f32.mrb[83].mxu1  ;;  %v2877_v41 = vsel %vm2876_vm7, %v2875_v37, 0.0 }
0x2583   : > { %2878 = vadd.xlane.f32.xlu1 %v2877_v41 }
0x2610   : > { %v2879_v42 = vpop.xlane.xlu1 %2878 }
0x2611   : > { %3650 = vrsqrt.f32 %v2879_v42 }
0x261b   : > { %v3651_v43 = vpop.eup %3650 }
0x261c   : > { %v2881_v44 = vmul.f32 %v3651_v43, %v2869_v35 }
0x261e   : > { %3502 = vmatmul.mubr.msk.f32.vlgmr.msra.gmra.mrb[84].mxu1 %vm2883_vm8, %v2881_v44 }
0x26f1   : > { %v2956_v45 = vpop.f32.mrb[84].mxu1 }
0x26f2   : > { %v3503_v46 = vpop.f32.mrb[85].mxu1  ;;  %v2961_v47 = vsel %vm2960_vm9, %v2956_v45, -inf }
0x26f3   : > { %2962 = vmax.xlane.f32.xlu1 %v2961_v47 }
0x2780   : > { %v2963_v48 = vpop.xlane.xlu1 %2962 }
0x2781   : > { %v2964_v49 = vsub.f32 %v2956_v45, %v2963_v48 }
0x2783   : > { %v2965_v50 = vmul.f32 1.442695, %v2964_v49 }
0x2785   : > { %3652 = vpow2.f32 %v2965_v50 }
0x278f   : > { %v3653_v51 = vpop.eup %3652 }
0x2790   : > { %v2967_v52 = vsel %vm2960_vm9, %v3653_v51, 0.0 }
0x2791   : > { %2968 = vadd.xlane.f32.xlu1 %v2967_v52 }
0x281e   : > { %v2969_v53 = vpop.xlane.xlu1 %2968 }
0x281f   : > { %3654 = vrcp.f32 %v2969_v53 }
0x2829   : > { %v3655_v54 = vpop.eup %3654 }
0x282a   : > { %v2971_v61 = vmul.f32 %v3655_v54, %v3653_v51 }
0x282c   : > { %2972 = vst.msk [vmem:[%s661_s26] sm:$0x1] %vm2960_vm9, %v2971_v61 }
0x282d   : > { %3669 = shalt.err (!%p3666_p3)
}
0x282e   : > { %s3670_s4 = scalar_lea.hbm %s4397_s30, 16  ;;  %s3674_s27 = scalar_lea.hbm %s4511_s28, 32 }
0x282f   : > { %p3671_p4 = scmp.ne.s32.totalorder %s4397_s30, %s3670_s4  ;;  %p3675_p9 = scmp.lt.u32.totalorder %s4397_s30, %s4511_s28 }
0x2830   : > { %p3676_p10 = scmp.lt.u32.totalorder %s3674_s27, %s3670_s4  ;;  %p3678_p12 = scmp.lt.u32.totalorder %s3670_s4, %s4397_s30 }
0x2831   : > { %p3672_p7 = pnand %p3671_p4, %p3884_p5 }
0x2832   : > { %p3677_p11 = por %p3676_p10, %p3675_p9 }
0x2833   : > { %p3673_p8 = pneg %p3672_p7 }
0x2834   : > { %p3679_p13 = por %p3678_p12, %p3677_p11 }
0x2836   : > { %p3680_p0 = pnand %p3679_p13, %p3673_p8 }
0x2838   : > { %3683 = shalt.err (!%p3680_p0)
}
0x2839   : > { %3504 = dma.vmem_to_hbm [thread:$0]  (%p3884_p5), %s4399_s21, 16, %s4397_s30, %s2974_s23  }
0x283a PF: > { %s4512_s0 = sld [smem:[#allocation7_spill]]  ;;  %s4513_s22 = sld [smem:[#allocation5_spill]] }
0x2840   : > { %p3510_p1 = scmp.ge.s32.totalorder %s4512_s0, 2  ;;  %s2998_s29 = sand.u32 1, %s4513_s22  }
0x2841   : > { %s2999_s26 = scalar_lea.sflag [#allocation3], %s2998_s29 }
0x2842   : > { %p3507_p2 = pnand %p3510_p1, %p3888_p6 }
0x2844   : > { %3701 = dma.done.wait (!%p3507_p2), %s2999_s26, 16  }
0x2845   : > { %3703 = vsyncadd (!%p3507_p2), %s2999_s26, 4294967280  ;;  %s4515_s27 = sld [smem:[#allocation8_spill]]  ;;  %s4516_s4 = sld [smem:[#allocation6_spill]] }
0x2846   : > { %s4517_s26 = sld [smem:[#allocation9_spill]]  ;;  %s4518_s2 = smov %s3710_s25 }
0x284b   : > { %p31_p3 = scmp.ge.s32.totalorder %s4515_s27, 4   ;;  %s4519_s25 = smov %s4516_s4 }
0x284d   :  { %33 = sbr.rel (!%p31_p3) target bundleno = 11 (0xb), region = 154 }
0x2854   :  { %3003 = vsyncpa [#allocation3], 1 }
0x2855   :  { %3005 = vsyncpa [#allocation3 + $0x1], 1 }

</bundles_post_ra>
